<compile_context>
chip_gen: v7x
topology: tpu7x:2x2x1
jax: 0.10.0
libtpu: 0.0.40
codegen_flags: <defaults>
</compile_context>

<pallas_src>
import functools

import jax
import jax.numpy as jnp
from jax.experimental import pallas as pl
from jax.experimental.pallas import tpu as pltpu


DATA0 = 8  # data rows start at a sublane-aligned row inside the padded scratch


# ----------------------------------------------------------------------------
# Fused encoder kernel (one grid step = one batch element, fully VMEM-resident)
# ----------------------------------------------------------------------------
def _encoder_kernel(x_ref, w0_ref, wr_ref, cb_ref, g_ref, be_ref,
                    wp_ref, bp_ref, eps_ref, o_ref,
                    bufx, bufp0, bufp1,
                    *, T, K, pad, num_layers, latent_dim):
    # x_ref  : (1, T, Cin)        mel (channels-last)
    # w0_ref : (K, Cin, H)        layer-0 conv weight, per tap
    # wr_ref : ((NL-1)*K, H, H)   layers 1..NL-1 conv weights, per tap
    # cb_ref : (NL, H)            conv biases
    # g_ref  : (NL, H)            LayerNorm gamma
    # be_ref : (NL, H)            LayerNorm beta
    # wp_ref : (H, 2L)            [w_mean | w_log_var] (1x1 convs merged)
    # bp_ref : (1, 2L)            [b_mean | b_log_var]
    # eps_ref: (1, T, L)          reparameterization noise
    # o_ref  : (1, T, 3L)         packed output [mu | log_var | z]
    # bufx   : (Tp, Cin) f32      padded input scratch
    # bufp0/1: (Tp, H)   f32      padded ping-pong activation scratch
    L = latent_dim
    f32 = jnp.float32

    # Zero ONLY the halo rows read by the conv taps: [DATA0-pad, DATA0) and
    # [DATA0+T, DATA0+T+pad).  Data rows are fully overwritten every layer,
    # so no full-buffer clears.
    for buf in (bufx, bufp0, bufp1):
        zeros = jnp.zeros((pad, buf.shape[1]), f32)
        buf[pl.ds(DATA0 - pad, pad), :] = zeros
        buf[pl.ds(DATA0 + T, pad), :] = zeros

    # Stage this batch element's input into the padded scratch (aligned store).
    bufx[pl.ds(DATA0, T), :] = x_ref[0].astype(f32)

    mm_dtype = w0_ref.dtype  # f32 or bf16 (set in the wrapper)

    def conv_ln_relu(src, w_tap, bias, gamma, beta, dst):
        # K per-tap matmuls accumulated in f32 (no im2col / lane concat).
        acc = None
        for k in range(K):
            xk = src[pl.ds(DATA0 - pad + k, T), :].astype(mm_dtype)
            p = jnp.dot(xk, w_tap(k), preferred_element_type=f32)
            acc = p if acc is None else acc + p
        acc = acc + bias
        # One-pass LayerNorm over channels (eps = 1e-5, torch default);
        # gamma folded into a single scale.
        mean = jnp.mean(acc, axis=-1, keepdims=True)
        msq = jnp.mean(acc * acc, axis=-1, keepdims=True)
        inv = jax.lax.rsqrt(msq - mean * mean + 1e-5)
        scale = inv * gamma
        y = acc * scale + (beta - mean * scale)
        dst[pl.ds(DATA0, T), :] = jnp.maximum(y, 0.0)   # aligned store

    def row(ref, l):
        return ref[pl.ds(l, 1), :]   # static (1, H) slice

    # Layer 0: Cin -> H.
    conv_ln_relu(bufx, lambda k: w0_ref[k],
                 row(cb_ref, 0), row(g_ref, 0), row(be_ref, 0), bufp0)
    # Layers 1..NL-1: H -> H, ping-pong between the two activation buffers.
    ping = (bufp0, bufp1)
    for l in range(1, num_layers):
        src, dst = ping[(l - 1) % 2], ping[l % 2]
        conv_ln_relu(src, lambda k, l=l: wr_ref[(l - 1) * K + k],
                     row(cb_ref, l), row(g_ref, l), row(be_ref, l), dst)

    # Merged 1x1 projections + reparameterization.
    h = ping[(num_layers - 1) % 2][pl.ds(DATA0, T), :]          # (T, H), aligned
    mv = jnp.dot(h.astype(mm_dtype), wp_ref[...], preferred_element_type=f32)
    mv = mv + bp_ref[...]                                       # (T, 2L)
    mu = mv[:, :L]
    lv = mv[:, L:]
    z = mu + jnp.exp(0.5 * lv) * eps_ref[0]

    # Packed output [mu | log_var | z]; mu|log_var are already contiguous in mv,
    # so only two sliced stores (no concatenate, no zero filler).
    o_ref[0, :, 0:2 * L] = mv.astype(o_ref.dtype)
    o_ref[0, :, 2 * L:3 * L] = z.astype(o_ref.dtype)


# ----------------------------------------------------------------------------
# Wrapper: single pallas_call over the batch
# ----------------------------------------------------------------------------
@functools.partial(jax.jit, static_argnames=("matmul_dtype",))
def posterior_encoder_forward(params, x_bct, eps_blt, *,
                              matmul_dtype=jnp.float32):
    """x_bct: (B, C_in, T) like PyTorch; returns z, mu, log_var as (B, L, T).

    Set matmul_dtype=jnp.bfloat16 on v6e/v7x for full-rate MXU; LN/ReLU/reparam
    stay f32 inside the kernel.
    """
    B, Cin, T = x_bct.shape
    w0 = params["w0"].astype(matmul_dtype)        # (K, Cin, H)
    wr = params["w_rest"].astype(matmul_dtype)    # ((NL-1)*K, H, H)
    cb = params["conv_bias"]                      # (NL, H)
    g = params["gamma"]                           # (NL, H)
    be = params["beta"]                           # (NL, H)
    wp = params["wp"].astype(matmul_dtype)        # (H, 2L)
    bp = params["bp"]                             # (1, 2L)

    K, _, H = params["w0"].shape
    NL = cb.shape[0]
    L = wp.shape[1] // 2
    pad = K // 2
    assert pad <= DATA0
    Tp = DATA0 + ((T + pad + 7) // 8) * 8         # sublane-aligned scratch rows
    OUT_W = 3 * L                                 # [mu | log_var | z]

    # TODO(synk): for production shapes, benchmark accepting (B, T, C) inputs /
    # returning (B, T, L) outputs to avoid these HBM-level boundary transposes.
    x_btc = jnp.transpose(x_bct, (0, 2, 1))       # (B, T, Cin)
    eps_btl = jnp.transpose(eps_blt, (0, 2, 1))   # (B, T, L)

    kernel = functools.partial(
        _encoder_kernel, T=T, K=K, pad=pad, num_layers=NL, latent_dim=L)

    out = pl.pallas_call(
        kernel,
        out_shape=jax.ShapeDtypeStruct((B, T, OUT_W), x_bct.dtype),
        grid_spec=pltpu.PrefetchScalarGridSpec(
            num_scalar_prefetch=0,
            grid=(B,),
            in_specs=[
                pl.BlockSpec((1, T, Cin), lambda b: (b, 0, 0)),
                # Weight/bias blocks are grid-invariant (constant index_map).
                pl.BlockSpec(w0.shape, lambda b: (0, 0, 0)),
                pl.BlockSpec(wr.shape, lambda b: (0, 0, 0)),
                pl.BlockSpec(cb.shape, lambda b: (0, 0)),
                pl.BlockSpec(g.shape, lambda b: (0, 0)),
                pl.BlockSpec(be.shape, lambda b: (0, 0)),
                pl.BlockSpec(wp.shape, lambda b: (0, 0)),
                pl.BlockSpec(bp.shape, lambda b: (0, 0)),
                pl.BlockSpec((1, T, L), lambda b: (b, 0, 0)),
            ],
            out_specs=pl.BlockSpec((1, T, OUT_W), lambda b: (b, 0, 0)),
            scratch_shapes=[
                pltpu.VMEM((Tp, Cin), jnp.float32),
                pltpu.VMEM((Tp, H), jnp.float32),
                pltpu.VMEM((Tp, H), jnp.float32),
            ],
        ),
        compiler_params=pltpu.CompilerParams(
            dimension_semantics=("parallel",),
            vmem_limit_bytes=32 * 1024 * 1024),
    )(x_btc, w0, wr, cb, g, be, wp, bp, eps_btl)

    mu = out[:, :, :L]
    lv = out[:, :, L:2 * L]
    z = out[:, :, 2 * L:]
    to_blt = lambda a: jnp.transpose(a, (0, 2, 1))
    return to_blt(z), to_blt(mu), to_blt(lv)


# ----------------------------------------------------------------------------
# Parameter construction (deterministic, synthetic), pre-packed for the kernel
# ----------------------------------------------------------------------------
def init_params(key, in_channels, hidden_channels, latent_dim,
                kernel_size=5, num_layers=6):
    ws, bs, gs, betas = [], [], [], []
    for i in range(num_layers):
        cin = in_channels if i == 0 else hidden_channels
        key, k_w, k_b = jax.random.split(key, 3)
        scale = 1.0 / jnp.sqrt(float(cin * kernel_size))
        # Stored per-tap as (K, Cin, Cout).  PyTorch stores (Cout, Cin, K):
        # port a checkpoint with transpose(w_torch, (2, 1, 0)).
        w = jax.random.uniform(k_w, (kernel_size, cin, hidden_channels),
                               jnp.float32, -scale, scale)
        b = jax.random.uniform(k_b, (hidden_channels,), jnp.float32,
                               -scale, scale)
        ws.append(w)
        bs.append(b)
        gs.append(jnp.ones((hidden_channels,), jnp.float32))
        betas.append(jnp.zeros((hidden_channels,), jnp.float32))

    # Layers 1..NL-1 stacked per tap along the leading axis: ((NL-1)*K, H, H).
    w_rest = jnp.concatenate(ws[1:], axis=0)

    def proj_init(key, cin, cout):
        k_w, k_b = jax.random.split(key)
        scale = 1.0 / jnp.sqrt(float(cin))
        w = jax.random.uniform(k_w, (cin, cout), jnp.float32, -scale, scale)
        b = jax.random.uniform(k_b, (cout,), jnp.float32, -scale, scale)
        return w, b

    key, k_m, k_v = jax.random.split(key, 3)
    wm, bm = proj_init(k_m, hidden_channels, latent_dim)
    wv, bv = proj_init(k_v, hidden_channels, latent_dim)

    return {
        "w0": ws[0],                               # (K, Cin, H)
        "w_rest": w_rest,                          # ((NL-1)*K, H, H)
        "conv_bias": jnp.stack(bs, axis=0),        # (NL, H)
        "gamma": jnp.stack(gs, axis=0),            # (NL, H)
        "beta": jnp.stack(betas, axis=0),          # (NL, H)
        "wp": jnp.concatenate([wm, wv], axis=1),   # (H, 2L) = [mean | log_var]
        "bp": jnp.concatenate([bm, bv])[None, :],  # (1, 2L)
    }


# ----------------------------------------------------------------------------
# Pure-JAX reference (same math, unfused) for a correctness check
# ----------------------------------------------------------------------------
def _reference_forward(params, x_bct, eps_blt):
    B, Cin, T = x_bct.shape
    w0, wr = params["w0"], params["w_rest"]
    cb, g, be = params["conv_bias"], params["gamma"], params["beta"]
    wp, bp = params["wp"], params["bp"]
    K = w0.shape[0]
    NL = cb.shape[0]
    L = wp.shape[1] // 2
    pad = K // 2
    ws = [w0] + [wr[(l - 1) * K:l * K] for l in range(1, NL)]

    hi = jnp.transpose(x_bct, (0, 2, 1))  # (B, T, Cin)
    for l in range(NL):
        hp = jnp.pad(hi, ((0, 0), (pad, pad), (0, 0)))
        acc = cb[l][None, None, :]
        for k in range(K):
            acc = acc + jnp.einsum("btc,co->bto", hp[:, k:k + T, :], ws[l][k],
                                   precision=jax.lax.Precision.HIGHEST)
        mean = acc.mean(-1, keepdims=True)
        var = ((acc - mean) ** 2).mean(-1, keepdims=True)
        hi = jnp.maximum(
            (acc - mean) * jax.lax.rsqrt(var + 1e-5) * g[l] + be[l], 0.0)

    mv = jnp.einsum("bth,hl->btl", hi, wp,
                    precision=jax.lax.Precision.HIGHEST) + bp[0]
    mu, lv = mv[..., :L], mv[..., L:]
    z = mu + jnp.exp(0.5 * lv) * jnp.transpose(eps_blt, (0, 2, 1))
    t = lambda a: jnp.transpose(a, (0, 2, 1))
    return t(z), t(mu), t(lv)


if __name__ == "__main__":
    B, C_IN, T = 2, 80, 16
    HIDDEN, LATENT, KSIZE, NLAYERS = 32, 8, 5, 6

    key = jax.random.PRNGKey(0)
    k_params, k_x, k_eps = jax.random.split(key, 3)

    params = init_params(k_params, C_IN, HIDDEN, LATENT, KSIZE, NLAYERS)
    x = jax.random.normal(k_x, (B, C_IN, T), jnp.float32)        # mel [B, 80, T]
    eps = jax.random.normal(k_eps, (B, LATENT, T), jnp.float32)  # reparam noise

    z, mu, log_var = posterior_encoder_forward(params, x, eps)
    jax.block_until_ready((z, mu, log_var))

    assert z.shape == (B, LATENT, T)
    assert mu.shape == (B, LATENT, T)
    assert log_var.shape == (B, LATENT, T)

    # Reparameterization identity (elementwise -> tight tolerance).
    recon = mu + jnp.exp(0.5 * log_var) * eps
    assert jnp.allclose(recon, z, atol=1e-4)

    # Cross-check against the unfused pure-JAX reference.  Tolerance is loose
    # enough to absorb XLA-vs-Mosaic f32 matmul precision differences.
    z_r, mu_r, lv_r = _reference_forward(params, x, eps)
    assert jnp.allclose(mu, mu_r, atol=2e-2, rtol=2e-2)
    assert jnp.allclose(log_var, lv_r, atol=2e-2, rtol=2e-2)
    assert jnp.allclose(z, z_r, atol=2e-2, rtol=2e-2)

    print("KERNEL_OK")
</pallas_src>

<mosaic_0001>
module attributes {stable_mosaic.version = 11 : i64} {
  func.func @_encoder_kernel(%arg0: i32, %arg1: memref<1x16x80xf32, #tpu.memory_space<vmem>>, %arg2: memref<5x80x32xf32, #tpu.memory_space<vmem>>, %arg3: memref<25x32x32xf32, #tpu.memory_space<vmem>>, %arg4: memref<6x32xf32, #tpu.memory_space<vmem>>, %arg5: memref<6x32xf32, #tpu.memory_space<vmem>>, %arg6: memref<6x32xf32, #tpu.memory_space<vmem>>, %arg7: memref<32x16xf32, #tpu.memory_space<vmem>>, %arg8: memref<1x16xf32, #tpu.memory_space<vmem>>, %arg9: memref<1x16x8xf32, #tpu.memory_space<vmem>>, %arg10: memref<1x16x24xf32, #tpu.memory_space<vmem>>, %arg11: memref<32x80xf32, #tpu.memory_space<vmem>>, %arg12: memref<32x32xf32, #tpu.memory_space<vmem>>, %arg13: memref<32x32xf32, #tpu.memory_space<vmem>>) attributes {dimension_semantics = [#tpu.dimension_semantics<parallel>], iteration_bounds = array<i64: 2>, scalar_prefetch = 0 : i64, scratch_operands = 3 : i64, tpu.core_type = #tpu.core_type<tc>, window_params = [{transform_indices = @transform_0, window_bounds = array<i64: 1, 16, 80>}, {pipeline_mode = #tpu.pipeline_mode<synchronous>, transform_indices = @transform_1, window_bounds = array<i64: 5, 80, 32>}, {pipeline_mode = #tpu.pipeline_mode<synchronous>, transform_indices = @transform_2, window_bounds = array<i64: 25, 32, 32>}, {pipeline_mode = #tpu.pipeline_mode<synchronous>, transform_indices = @transform_3, window_bounds = array<i64: 6, 32>}, {pipeline_mode = #tpu.pipeline_mode<synchronous>, transform_indices = @transform_4, window_bounds = array<i64: 6, 32>}, {pipeline_mode = #tpu.pipeline_mode<synchronous>, transform_indices = @transform_5, window_bounds = array<i64: 6, 32>}, {pipeline_mode = #tpu.pipeline_mode<synchronous>, transform_indices = @transform_6, window_bounds = array<i64: 32, 16>}, {pipeline_mode = #tpu.pipeline_mode<synchronous>, transform_indices = @transform_7, window_bounds = array<i64: 1, 16>}, {transform_indices = @transform_8, window_bounds = array<i64: 1, 16, 8>}, {transform_indices = @transform_9, window_bounds = array<i64: 1, 16, 24>}]} {
    %cst = arith.constant 0.000000e+00 : f32
    %0 = vector.broadcast %cst : f32 to vector<2x80xf32>
    %c6 = arith.constant 6 : index
    %c0 = arith.constant 0 : index
    %1 = vector.load %arg11[%c6, %c0] : memref<32x80xf32, #tpu.memory_space<vmem>>, vector<2x80xf32>
    tpu.vector_store %arg11[%c6, %c0], %0 {strides = array<i32>} : memref<32x80xf32, #tpu.memory_space<vmem>>, vector<2x80xf32>,
    %c24 = arith.constant 24 : index
    %c0_0 = arith.constant 0 : index
    %2 = vector.load %arg11[%c24, %c0_0] : memref<32x80xf32, #tpu.memory_space<vmem>>, vector<2x80xf32>
    tpu.vector_store %arg11[%c24, %c0_0], %0 {strides = array<i32>} : memref<32x80xf32, #tpu.memory_space<vmem>>, vector<2x80xf32>,
    %cst_1 = arith.constant 0.000000e+00 : f32
    %3 = vector.broadcast %cst_1 : f32 to vector<2x32xf32>
    %c6_2 = arith.constant 6 : index
    %c0_3 = arith.constant 0 : index
    %4 = vector.load %arg12[%c6_2, %c0_3] : memref<32x32xf32, #tpu.memory_space<vmem>>, vector<2x32xf32>
    tpu.vector_store %arg12[%c6_2, %c0_3], %3 {strides = array<i32>} : memref<32x32xf32, #tpu.memory_space<vmem>>, vector<2x32xf32>,
    %c24_4 = arith.constant 24 : index
    %c0_5 = arith.constant 0 : index
    %5 = vector.load %arg12[%c24_4, %c0_5] : memref<32x32xf32, #tpu.memory_space<vmem>>, vector<2x32xf32>
    tpu.vector_store %arg12[%c24_4, %c0_5], %3 {strides = array<i32>} : memref<32x32xf32, #tpu.memory_space<vmem>>, vector<2x32xf32>,
    %cst_6 = arith.constant 0.000000e+00 : f32
    %6 = vector.broadcast %cst_6 : f32 to vector<2x32xf32>
    %c6_7 = arith.constant 6 : index
    %c0_8 = arith.constant 0 : index
    %7 = vector.load %arg13[%c6_7, %c0_8] : memref<32x32xf32, #tpu.memory_space<vmem>>, vector<2x32xf32>
    tpu.vector_store %arg13[%c6_7, %c0_8], %6 {strides = array<i32>} : memref<32x32xf32, #tpu.memory_space<vmem>>, vector<2x32xf32>,
    %c24_9 = arith.constant 24 : index
    %c0_10 = arith.constant 0 : index
    %8 = vector.load %arg13[%c24_9, %c0_10] : memref<32x32xf32, #tpu.memory_space<vmem>>, vector<2x32xf32>
    tpu.vector_store %arg13[%c24_9, %c0_10], %6 {strides = array<i32>} : memref<32x32xf32, #tpu.memory_space<vmem>>, vector<2x32xf32>,
    %c0_11 = arith.constant 0 : index
    %c0_12 = arith.constant 0 : index
    %c0_13 = arith.constant 0 : index
    %9 = vector.load %arg1[%c0_11, %c0_12, %c0_13] : memref<1x16x80xf32, #tpu.memory_space<vmem>>, vector<1x16x80xf32>
    %10 = vector.shape_cast %9 : vector<1x16x80xf32> to vector<16x80xf32>
    %c8 = arith.constant 8 : index
    %c0_14 = arith.constant 0 : index
    %11 = vector.load %arg11[%c8, %c0_14] : memref<32x80xf32, #tpu.memory_space<vmem>>, vector<16x80xf32>
    tpu.vector_store %arg11[%c8, %c0_14], %10 {strides = array<i32>} : memref<32x80xf32, #tpu.memory_space<vmem>>, vector<16x80xf32>,
    %c0_15 = arith.constant 0 : index
    %c0_16 = arith.constant 0 : index
    %12 = vector.load %arg4[%c0_15, %c0_16] : memref<6x32xf32, #tpu.memory_space<vmem>>, vector<1x32xf32>
    %c0_17 = arith.constant 0 : index
    %c0_18 = arith.constant 0 : index
    %13 = vector.load %arg5[%c0_17, %c0_18] : memref<6x32xf32, #tpu.memory_space<vmem>>, vector<1x32xf32>
    %c0_19 = arith.constant 0 : index
    %c0_20 = arith.constant 0 : index
    %14 = vector.load %arg6[%c0_19, %c0_20] : memref<6x32xf32, #tpu.memory_space<vmem>>, vector<1x32xf32>
    %c6_21 = arith.constant 6 : index
    %c0_22 = arith.constant 0 : index
    %15 = vector.load %arg11[%c6_21, %c0_22] : memref<32x80xf32, #tpu.memory_space<vmem>>, vector<16x80xf32>
    %c0_23 = arith.constant 0 : index
    %c0_24 = arith.constant 0 : index
    %c0_25 = arith.constant 0 : index
    %16 = vector.load %arg2[%c0_23, %c0_24, %c0_25] : memref<5x80x32xf32, #tpu.memory_space<vmem>>, vector<1x80x32xf32>
    %17 = vector.shape_cast %16 : vector<1x80x32xf32> to vector<80x32xf32>
    %cst_26 = arith.constant dense<0.000000e+00> : vector<16x32xf32>
    %18 = tpu.matmul %15, %17, %cst_26 {dimension_numbers = #tpu.dot_dimension_numbers<[1], [0], [0], [1], [0, 0, 1, 1], [], []>} : vector<16x80xf32>, vector<80x32xf32>, vector<16x32xf32> -> vector<16x32xf32>
    %c7 = arith.constant 7 : index
    %c0_27 = arith.constant 0 : index
    %19 = vector.load %arg11[%c7, %c0_27] : memref<32x80xf32, #tpu.memory_space<vmem>>, vector<16x80xf32>
    %c1 = arith.constant 1 : index
    %c0_28 = arith.constant 0 : index
    %c0_29 = arith.constant 0 : index
    %20 = vector.load %arg2[%c1, %c0_28, %c0_29] : memref<5x80x32xf32, #tpu.memory_space<vmem>>, vector<1x80x32xf32>
    %21 = vector.shape_cast %20 : vector<1x80x32xf32> to vector<80x32xf32>
    %cst_30 = arith.constant dense<0.000000e+00> : vector<16x32xf32>
    %22 = tpu.matmul %19, %21, %cst_30 {dimension_numbers = #tpu.dot_dimension_numbers<[1], [0], [0], [1], [0, 0, 1, 1], [], []>} : vector<16x80xf32>, vector<80x32xf32>, vector<16x32xf32> -> vector<16x32xf32>
    %23 = arith.addf %18, %22 : vector<16x32xf32>
    %c8_31 = arith.constant 8 : index
    %c0_32 = arith.constant 0 : index
    %24 = vector.load %arg11[%c8_31, %c0_32] : memref<32x80xf32, #tpu.memory_space<vmem>>, vector<16x80xf32>
    %c2 = arith.constant 2 : index
    %c0_33 = arith.constant 0 : index
    %c0_34 = arith.constant 0 : index
    %25 = vector.load %arg2[%c2, %c0_33, %c0_34] : memref<5x80x32xf32, #tpu.memory_space<vmem>>, vector<1x80x32xf32>
    %26 = vector.shape_cast %25 : vector<1x80x32xf32> to vector<80x32xf32>
    %cst_35 = arith.constant dense<0.000000e+00> : vector<16x32xf32>
    %27 = tpu.matmul %24, %26, %cst_35 {dimension_numbers = #tpu.dot_dimension_numbers<[1], [0], [0], [1], [0, 0, 1, 1], [], []>} : vector<16x80xf32>, vector<80x32xf32>, vector<16x32xf32> -> vector<16x32xf32>
    %28 = arith.addf %23, %27 : vector<16x32xf32>
    %c9 = arith.constant 9 : index
    %c0_36 = arith.constant 0 : index
    %29 = vector.load %arg11[%c9, %c0_36] : memref<32x80xf32, #tpu.memory_space<vmem>>, vector<16x80xf32>
    %c3 = arith.constant 3 : index
    %c0_37 = arith.constant 0 : index
    %c0_38 = arith.constant 0 : index
    %30 = vector.load %arg2[%c3, %c0_37, %c0_38] : memref<5x80x32xf32, #tpu.memory_space<vmem>>, vector<1x80x32xf32>
    %31 = vector.shape_cast %30 : vector<1x80x32xf32> to vector<80x32xf32>
    %cst_39 = arith.constant dense<0.000000e+00> : vector<16x32xf32>
    %32 = tpu.matmul %29, %31, %cst_39 {dimension_numbers = #tpu.dot_dimension_numbers<[1], [0], [0], [1], [0, 0, 1, 1], [], []>} : vector<16x80xf32>, vector<80x32xf32>, vector<16x32xf32> -> vector<16x32xf32>
    %33 = arith.addf %28, %32 : vector<16x32xf32>
    %c10 = arith.constant 10 : index
    %c0_40 = arith.constant 0 : index
    %34 = vector.load %arg11[%c10, %c0_40] : memref<32x80xf32, #tpu.memory_space<vmem>>, vector<16x80xf32>
    %c4 = arith.constant 4 : index
    %c0_41 = arith.constant 0 : index
    %c0_42 = arith.constant 0 : index
    %35 = vector.load %arg2[%c4, %c0_41, %c0_42] : memref<5x80x32xf32, #tpu.memory_space<vmem>>, vector<1x80x32xf32>
    %36 = vector.shape_cast %35 : vector<1x80x32xf32> to vector<80x32xf32>
    %cst_43 = arith.constant dense<0.000000e+00> : vector<16x32xf32>
    %37 = tpu.matmul %34, %36, %cst_43 {dimension_numbers = #tpu.dot_dimension_numbers<[1], [0], [0], [1], [0, 0, 1, 1], [], []>} : vector<16x80xf32>, vector<80x32xf32>, vector<16x32xf32> -> vector<16x32xf32>
    %38 = arith.addf %33, %37 : vector<16x32xf32>
    %39 = vector.broadcast %12 : vector<1x32xf32> to vector<16x32xf32>
    %40 = arith.addf %38, %39 : vector<16x32xf32>
    %cst_44 = arith.constant dense<0.000000e+00> : vector<16xf32>
    %41 = vector.multi_reduction <add>, %40, %cst_44 [1] : vector<16x32xf32> to vector<16xf32>
    %42 = vector.shape_cast %41 : vector<16xf32> to vector<16x1xf32>
    %cst_45 = arith.constant 3.200000e+01 : f32
    %43 = vector.broadcast %cst_45 : f32 to vector<16x1xf32>
    %44 = arith.divf %42, %43 : vector<16x1xf32>
    %45 = arith.mulf %40, %40 : vector<16x32xf32>
    %cst_46 = arith.constant dense<0.000000e+00> : vector<16xf32>
    %46 = vector.multi_reduction <add>, %45, %cst_46 [1] : vector<16x32xf32> to vector<16xf32>
    %47 = vector.shape_cast %46 : vector<16xf32> to vector<16x1xf32>
    %cst_47 = arith.constant 3.200000e+01 : f32
    %48 = vector.broadcast %cst_47 : f32 to vector<16x1xf32>
    %49 = arith.divf %47, %48 : vector<16x1xf32>
    %50 = arith.mulf %44, %44 : vector<16x1xf32>
    %51 = arith.subf %49, %50 : vector<16x1xf32>
    %cst_48 = arith.constant 9.99999974E-6 : f32
    %52 = vector.broadcast %cst_48 : f32 to vector<16x1xf32>
    %53 = arith.addf %51, %52 : vector<16x1xf32>
    %54 = math.rsqrt %53 : vector<16x1xf32>
    %55 = vector.broadcast %54 : vector<16x1xf32> to vector<16x32xf32>
    %56 = vector.broadcast %13 : vector<1x32xf32> to vector<16x32xf32>
    %57 = arith.mulf %55, %56 : vector<16x32xf32>
    %58 = arith.mulf %40, %57 : vector<16x32xf32>
    %59 = vector.broadcast %44 : vector<16x1xf32> to vector<16x32xf32>
    %60 = arith.mulf %59, %57 : vector<16x32xf32>
    %61 = vector.broadcast %14 : vector<1x32xf32> to vector<16x32xf32>
    %62 = arith.subf %61, %60 : vector<16x32xf32>
    %63 = arith.addf %58, %62 : vector<16x32xf32>
    %cst_49 = arith.constant 0.000000e+00 : f32
    %64 = vector.broadcast %cst_49 : f32 to vector<16x32xf32>
    %65 = arith.maximumf %63, %64 : vector<16x32xf32>
    %c8_50 = arith.constant 8 : index
    %c0_51 = arith.constant 0 : index
    %66 = vector.load %arg12[%c8_50, %c0_51] : memref<32x32xf32, #tpu.memory_space<vmem>>, vector<16x32xf32>
    tpu.vector_store %arg12[%c8_50, %c0_51], %65 {strides = array<i32>} : memref<32x32xf32, #tpu.memory_space<vmem>>, vector<16x32xf32>,
    %c1_52 = arith.constant 1 : index
    %c0_53 = arith.constant 0 : index
    %67 = vector.load %arg4[%c1_52, %c0_53] : memref<6x32xf32, #tpu.memory_space<vmem>>, vector<1x32xf32>
    %c1_54 = arith.constant 1 : index
    %c0_55 = arith.constant 0 : index
    %68 = vector.load %arg5[%c1_54, %c0_55] : memref<6x32xf32, #tpu.memory_space<vmem>>, vector<1x32xf32>
    %c1_56 = arith.constant 1 : index
    %c0_57 = arith.constant 0 : index
    %69 = vector.load %arg6[%c1_56, %c0_57] : memref<6x32xf32, #tpu.memory_space<vmem>>, vector<1x32xf32>
    %c6_58 = arith.constant 6 : index
    %c0_59 = arith.constant 0 : index
    %70 = vector.load %arg12[%c6_58, %c0_59] : memref<32x32xf32, #tpu.memory_space<vmem>>, vector<16x32xf32>
    %c0_60 = arith.constant 0 : index
    %c0_61 = arith.constant 0 : index
    %c0_62 = arith.constant 0 : index
    %71 = vector.load %arg3[%c0_60, %c0_61, %c0_62] : memref<25x32x32xf32, #tpu.memory_space<vmem>>, vector<1x32x32xf32>
    %72 = vector.shape_cast %71 : vector<1x32x32xf32> to vector<32x32xf32>
    %cst_63 = arith.constant dense<0.000000e+00> : vector<16x32xf32>
    %73 = tpu.matmul %70, %72, %cst_63 {dimension_numbers = #tpu.dot_dimension_numbers<[1], [0], [0], [1], [0, 0, 1, 1], [], []>} : vector<16x32xf32>, vector<32x32xf32>, vector<16x32xf32> -> vector<16x32xf32>
    %c7_64 = arith.constant 7 : index
    %c0_65 = arith.constant 0 : index
    %74 = vector.load %arg12[%c7_64, %c0_65] : memref<32x32xf32, #tpu.memory_space<vmem>>, vector<16x32xf32>
    %c1_66 = arith.constant 1 : index
    %c0_67 = arith.constant 0 : index
    %c0_68 = arith.constant 0 : index
    %75 = vector.load %arg3[%c1_66, %c0_67, %c0_68] : memref<25x32x32xf32, #tpu.memory_space<vmem>>, vector<1x32x32xf32>
    %76 = vector.shape_cast %75 : vector<1x32x32xf32> to vector<32x32xf32>
    %cst_69 = arith.constant dense<0.000000e+00> : vector<16x32xf32>
    %77 = tpu.matmul %74, %76, %cst_69 {dimension_numbers = #tpu.dot_dimension_numbers<[1], [0], [0], [1], [0, 0, 1, 1], [], []>} : vector<16x32xf32>, vector<32x32xf32>, vector<16x32xf32> -> vector<16x32xf32>
    %78 = arith.addf %73, %77 : vector<16x32xf32>
    %c8_70 = arith.constant 8 : index
    %c0_71 = arith.constant 0 : index
    %79 = vector.load %arg12[%c8_70, %c0_71] : memref<32x32xf32, #tpu.memory_space<vmem>>, vector<16x32xf32>
    %c2_72 = arith.constant 2 : index
    %c0_73 = arith.constant 0 : index
    %c0_74 = arith.constant 0 : index
    %80 = vector.load %arg3[%c2_72, %c0_73, %c0_74] : memref<25x32x32xf32, #tpu.memory_space<vmem>>, vector<1x32x32xf32>
    %81 = vector.shape_cast %80 : vector<1x32x32xf32> to vector<32x32xf32>
    %cst_75 = arith.constant dense<0.000000e+00> : vector<16x32xf32>
    %82 = tpu.matmul %79, %81, %cst_75 {dimension_numbers = #tpu.dot_dimension_numbers<[1], [0], [0], [1], [0, 0, 1, 1], [], []>} : vector<16x32xf32>, vector<32x32xf32>, vector<16x32xf32> -> vector<16x32xf32>
    %83 = arith.addf %78, %82 : vector<16x32xf32>
    %c9_76 = arith.constant 9 : index
    %c0_77 = arith.constant 0 : index
    %84 = vector.load %arg12[%c9_76, %c0_77] : memref<32x32xf32, #tpu.memory_space<vmem>>, vector<16x32xf32>
    %c3_78 = arith.constant 3 : index
    %c0_79 = arith.constant 0 : index
    %c0_80 = arith.constant 0 : index
    %85 = vector.load %arg3[%c3_78, %c0_79, %c0_80] : memref<25x32x32xf32, #tpu.memory_space<vmem>>, vector<1x32x32xf32>
    %86 = vector.shape_cast %85 : vector<1x32x32xf32> to vector<32x32xf32>
    %cst_81 = arith.constant dense<0.000000e+00> : vector<16x32xf32>
    %87 = tpu.matmul %84, %86, %cst_81 {dimension_numbers = #tpu.dot_dimension_numbers<[1], [0], [0], [1], [0, 0, 1, 1], [], []>} : vector<16x32xf32>, vector<32x32xf32>, vector<16x32xf32> -> vector<16x32xf32>
    %88 = arith.addf %83, %87 : vector<16x32xf32>
    %c10_82 = arith.constant 10 : index
    %c0_83 = arith.constant 0 : index
    %89 = vector.load %arg12[%c10_82, %c0_83] : memref<32x32xf32, #tpu.memory_space<vmem>>, vector<16x32xf32>
    %c4_84 = arith.constant 4 : index
    %c0_85 = arith.constant 0 : index
    %c0_86 = arith.constant 0 : index
    %90 = vector.load %arg3[%c4_84, %c0_85, %c0_86] : memref<25x32x32xf32, #tpu.memory_space<vmem>>, vector<1x32x32xf32>
    %91 = vector.shape_cast %90 : vector<1x32x32xf32> to vector<32x32xf32>
    %cst_87 = arith.constant dense<0.000000e+00> : vector<16x32xf32>
    %92 = tpu.matmul %89, %91, %cst_87 {dimension_numbers = #tpu.dot_dimension_numbers<[1], [0], [0], [1], [0, 0, 1, 1], [], []>} : vector<16x32xf32>, vector<32x32xf32>, vector<16x32xf32> -> vector<16x32xf32>
    %93 = arith.addf %88, %92 : vector<16x32xf32>
    %94 = vector.broadcast %67 : vector<1x32xf32> to vector<16x32xf32>
    %95 = arith.addf %93, %94 : vector<16x32xf32>
    %cst_88 = arith.constant dense<0.000000e+00> : vector<16xf32>
    %96 = vector.multi_reduction <add>, %95, %cst_88 [1] : vector<16x32xf32> to vector<16xf32>
    %97 = vector.shape_cast %96 : vector<16xf32> to vector<16x1xf32>
    %cst_89 = arith.constant 3.200000e+01 : f32
    %98 = vector.broadcast %cst_89 : f32 to vector<16x1xf32>
    %99 = arith.divf %97, %98 : vector<16x1xf32>
    %100 = arith.mulf %95, %95 : vector<16x32xf32>
    %cst_90 = arith.constant dense<0.000000e+00> : vector<16xf32>
    %101 = vector.multi_reduction <add>, %100, %cst_90 [1] : vector<16x32xf32> to vector<16xf32>
    %102 = vector.shape_cast %101 : vector<16xf32> to vector<16x1xf32>
    %cst_91 = arith.constant 3.200000e+01 : f32
    %103 = vector.broadcast %cst_91 : f32 to vector<16x1xf32>
    %104 = arith.divf %102, %103 : vector<16x1xf32>
    %105 = arith.mulf %99, %99 : vector<16x1xf32>
    %106 = arith.subf %104, %105 : vector<16x1xf32>
    %cst_92 = arith.constant 9.99999974E-6 : f32
    %107 = vector.broadcast %cst_92 : f32 to vector<16x1xf32>
    %108 = arith.addf %106, %107 : vector<16x1xf32>
    %109 = math.rsqrt %108 : vector<16x1xf32>
    %110 = vector.broadcast %109 : vector<16x1xf32> to vector<16x32xf32>
    %111 = vector.broadcast %68 : vector<1x32xf32> to vector<16x32xf32>
    %112 = arith.mulf %110, %111 : vector<16x32xf32>
    %113 = arith.mulf %95, %112 : vector<16x32xf32>
    %114 = vector.broadcast %99 : vector<16x1xf32> to vector<16x32xf32>
    %115 = arith.mulf %114, %112 : vector<16x32xf32>
    %116 = vector.broadcast %69 : vector<1x32xf32> to vector<16x32xf32>
    %117 = arith.subf %116, %115 : vector<16x32xf32>
    %118 = arith.addf %113, %117 : vector<16x32xf32>
    %cst_93 = arith.constant 0.000000e+00 : f32
    %119 = vector.broadcast %cst_93 : f32 to vector<16x32xf32>
    %120 = arith.maximumf %118, %119 : vector<16x32xf32>
    %c8_94 = arith.constant 8 : index
    %c0_95 = arith.constant 0 : index
    %121 = vector.load %arg13[%c8_94, %c0_95] : memref<32x32xf32, #tpu.memory_space<vmem>>, vector<16x32xf32>
    tpu.vector_store %arg13[%c8_94, %c0_95], %120 {strides = array<i32>} : memref<32x32xf32, #tpu.memory_space<vmem>>, vector<16x32xf32>,
    %c2_96 = arith.constant 2 : index
    %c0_97 = arith.constant 0 : index
    %122 = vector.load %arg4[%c2_96, %c0_97] : memref<6x32xf32, #tpu.memory_space<vmem>>, vector<1x32xf32>
    %c2_98 = arith.constant 2 : index
    %c0_99 = arith.constant 0 : index
    %123 = vector.load %arg5[%c2_98, %c0_99] : memref<6x32xf32, #tpu.memory_space<vmem>>, vector<1x32xf32>
    %c2_100 = arith.constant 2 : index
    %c0_101 = arith.constant 0 : index
    %124 = vector.load %arg6[%c2_100, %c0_101] : memref<6x32xf32, #tpu.memory_space<vmem>>, vector<1x32xf32>
    %c6_102 = arith.constant 6 : index
    %c0_103 = arith.constant 0 : index
    %125 = vector.load %arg13[%c6_102, %c0_103] : memref<32x32xf32, #tpu.memory_space<vmem>>, vector<16x32xf32>
    %c5 = arith.constant 5 : index
    %c0_104 = arith.constant 0 : index
    %c0_105 = arith.constant 0 : index
    %126 = vector.load %arg3[%c5, %c0_104, %c0_105] : memref<25x32x32xf32, #tpu.memory_space<vmem>>, vector<1x32x32xf32>
    %127 = vector.shape_cast %126 : vector<1x32x32xf32> to vector<32x32xf32>
    %cst_106 = arith.constant dense<0.000000e+00> : vector<16x32xf32>
    %128 = tpu.matmul %125, %127, %cst_106 {dimension_numbers = #tpu.dot_dimension_numbers<[1], [0], [0], [1], [0, 0, 1, 1], [], []>} : vector<16x32xf32>, vector<32x32xf32>, vector<16x32xf32> -> vector<16x32xf32>
    %c7_107 = arith.constant 7 : index
    %c0_108 = arith.constant 0 : index
    %129 = vector.load %arg13[%c7_107, %c0_108] : memref<32x32xf32, #tpu.memory_space<vmem>>, vector<16x32xf32>
    %c6_109 = arith.constant 6 : index
    %c0_110 = arith.constant 0 : index
    %c0_111 = arith.constant 0 : index
    %130 = vector.load %arg3[%c6_109, %c0_110, %c0_111] : memref<25x32x32xf32, #tpu.memory_space<vmem>>, vector<1x32x32xf32>
    %131 = vector.shape_cast %130 : vector<1x32x32xf32> to vector<32x32xf32>
    %cst_112 = arith.constant dense<0.000000e+00> : vector<16x32xf32>
    %132 = tpu.matmul %129, %131, %cst_112 {dimension_numbers = #tpu.dot_dimension_numbers<[1], [0], [0], [1], [0, 0, 1, 1], [], []>} : vector<16x32xf32>, vector<32x32xf32>, vector<16x32xf32> -> vector<16x32xf32>
    %133 = arith.addf %128, %132 : vector<16x32xf32>
    %c8_113 = arith.constant 8 : index
    %c0_114 = arith.constant 0 : index
    %134 = vector.load %arg13[%c8_113, %c0_114] : memref<32x32xf32, #tpu.memory_space<vmem>>, vector<16x32xf32>
    %c7_115 = arith.constant 7 : index
    %c0_116 = arith.constant 0 : index
    %c0_117 = arith.constant 0 : index
    %135 = vector.load %arg3[%c7_115, %c0_116, %c0_117] : memref<25x32x32xf32, #tpu.memory_space<vmem>>, vector<1x32x32xf32>
    %136 = vector.shape_cast %135 : vector<1x32x32xf32> to vector<32x32xf32>
    %cst_118 = arith.constant dense<0.000000e+00> : vector<16x32xf32>
    %137 = tpu.matmul %134, %136, %cst_118 {dimension_numbers = #tpu.dot_dimension_numbers<[1], [0], [0], [1], [0, 0, 1, 1], [], []>} : vector<16x32xf32>, vector<32x32xf32>, vector<16x32xf32> -> vector<16x32xf32>
    %138 = arith.addf %133, %137 : vector<16x32xf32>
    %c9_119 = arith.constant 9 : index
    %c0_120 = arith.constant 0 : index
    %139 = vector.load %arg13[%c9_119, %c0_120] : memref<32x32xf32, #tpu.memory_space<vmem>>, vector<16x32xf32>
    %c8_121 = arith.constant 8 : index
    %c0_122 = arith.constant 0 : index
    %c0_123 = arith.constant 0 : index
    %140 = vector.load %arg3[%c8_121, %c0_122, %c0_123] : memref<25x32x32xf32, #tpu.memory_space<vmem>>, vector<1x32x32xf32>
    %141 = vector.shape_cast %140 : vector<1x32x32xf32> to vector<32x32xf32>
    %cst_124 = arith.constant dense<0.000000e+00> : vector<16x32xf32>
    %142 = tpu.matmul %139, %141, %cst_124 {dimension_numbers = #tpu.dot_dimension_numbers<[1], [0], [0], [1], [0, 0, 1, 1], [], []>} : vector<16x32xf32>, vector<32x32xf32>, vector<16x32xf32> -> vector<16x32xf32>
    %143 = arith.addf %138, %142 : vector<16x32xf32>
    %c10_125 = arith.constant 10 : index
    %c0_126 = arith.constant 0 : index
    %144 = vector.load %arg13[%c10_125, %c0_126] : memref<32x32xf32, #tpu.memory_space<vmem>>, vector<16x32xf32>
    %c9_127 = arith.constant 9 : index
    %c0_128 = arith.constant 0 : index
    %c0_129 = arith.constant 0 : index
    %145 = vector.load %arg3[%c9_127, %c0_128, %c0_129] : memref<25x32x32xf32, #tpu.memory_space<vmem>>, vector<1x32x32xf32>
    %146 = vector.shape_cast %145 : vector<1x32x32xf32> to vector<32x32xf32>
    %cst_130 = arith.constant dense<0.000000e+00> : vector<16x32xf32>
    %147 = tpu.matmul %144, %146, %cst_130 {dimension_numbers = #tpu.dot_dimension_numbers<[1], [0], [0], [1], [0, 0, 1, 1], [], []>} : vector<16x32xf32>, vector<32x32xf32>, vector<16x32xf32> -> vector<16x32xf32>
    %148 = arith.addf %143, %147 : vector<16x32xf32>
    %149 = vector.broadcast %122 : vector<1x32xf32> to vector<16x32xf32>
    %150 = arith.addf %148, %149 : vector<16x32xf32>
    %cst_131 = arith.constant dense<0.000000e+00> : vector<16xf32>
    %151 = vector.multi_reduction <add>, %150, %cst_131 [1] : vector<16x32xf32> to vector<16xf32>
    %152 = vector.shape_cast %151 : vector<16xf32> to vector<16x1xf32>
    %cst_132 = arith.constant 3.200000e+01 : f32
    %153 = vector.broadcast %cst_132 : f32 to vector<16x1xf32>
    %154 = arith.divf %152, %153 : vector<16x1xf32>
    %155 = arith.mulf %150, %150 : vector<16x32xf32>
    %cst_133 = arith.constant dense<0.000000e+00> : vector<16xf32>
    %156 = vector.multi_reduction <add>, %155, %cst_133 [1] : vector<16x32xf32> to vector<16xf32>
    %157 = vector.shape_cast %156 : vector<16xf32> to vector<16x1xf32>
    %cst_134 = arith.constant 3.200000e+01 : f32
    %158 = vector.broadcast %cst_134 : f32 to vector<16x1xf32>
    %159 = arith.divf %157, %158 : vector<16x1xf32>
    %160 = arith.mulf %154, %154 : vector<16x1xf32>
    %161 = arith.subf %159, %160 : vector<16x1xf32>
    %cst_135 = arith.constant 9.99999974E-6 : f32
    %162 = vector.broadcast %cst_135 : f32 to vector<16x1xf32>
    %163 = arith.addf %161, %162 : vector<16x1xf32>
    %164 = math.rsqrt %163 : vector<16x1xf32>
    %165 = vector.broadcast %164 : vector<16x1xf32> to vector<16x32xf32>
    %166 = vector.broadcast %123 : vector<1x32xf32> to vector<16x32xf32>
    %167 = arith.mulf %165, %166 : vector<16x32xf32>
    %168 = arith.mulf %150, %167 : vector<16x32xf32>
    %169 = vector.broadcast %154 : vector<16x1xf32> to vector<16x32xf32>
    %170 = arith.mulf %169, %167 : vector<16x32xf32>
    %171 = vector.broadcast %124 : vector<1x32xf32> to vector<16x32xf32>
    %172 = arith.subf %171, %170 : vector<16x32xf32>
    %173 = arith.addf %168, %172 : vector<16x32xf32>
    %cst_136 = arith.constant 0.000000e+00 : f32
    %174 = vector.broadcast %cst_136 : f32 to vector<16x32xf32>
    %175 = arith.maximumf %173, %174 : vector<16x32xf32>
    %c8_137 = arith.constant 8 : index
    %c0_138 = arith.constant 0 : index
    %176 = vector.load %arg12[%c8_137, %c0_138] : memref<32x32xf32, #tpu.memory_space<vmem>>, vector<16x32xf32>
    tpu.vector_store %arg12[%c8_137, %c0_138], %175 {strides = array<i32>} : memref<32x32xf32, #tpu.memory_space<vmem>>, vector<16x32xf32>,
    %c3_139 = arith.constant 3 : index
    %c0_140 = arith.constant 0 : index
    %177 = vector.load %arg4[%c3_139, %c0_140] : memref<6x32xf32, #tpu.memory_space<vmem>>, vector<1x32xf32>
    %c3_141 = arith.constant 3 : index
    %c0_142 = arith.constant 0 : index
    %178 = vector.load %arg5[%c3_141, %c0_142] : memref<6x32xf32, #tpu.memory_space<vmem>>, vector<1x32xf32>
    %c3_143 = arith.constant 3 : index
    %c0_144 = arith.constant 0 : index
    %179 = vector.load %arg6[%c3_143, %c0_144] : memref<6x32xf32, #tpu.memory_space<vmem>>, vector<1x32xf32>
    %c6_145 = arith.constant 6 : index
    %c0_146 = arith.constant 0 : index
    %180 = vector.load %arg12[%c6_145, %c0_146] : memref<32x32xf32, #tpu.memory_space<vmem>>, vector<16x32xf32>
    %c10_147 = arith.constant 10 : index
    %c0_148 = arith.constant 0 : index
    %c0_149 = arith.constant 0 : index
    %181 = vector.load %arg3[%c10_147, %c0_148, %c0_149] : memref<25x32x32xf32, #tpu.memory_space<vmem>>, vector<1x32x32xf32>
    %182 = vector.shape_cast %181 : vector<1x32x32xf32> to vector<32x32xf32>
    %cst_150 = arith.constant dense<0.000000e+00> : vector<16x32xf32>
    %183 = tpu.matmul %180, %182, %cst_150 {dimension_numbers = #tpu.dot_dimension_numbers<[1], [0], [0], [1], [0, 0, 1, 1], [], []>} : vector<16x32xf32>, vector<32x32xf32>, vector<16x32xf32> -> vector<16x32xf32>
    %c7_151 = arith.constant 7 : index
    %c0_152 = arith.constant 0 : index
    %184 = vector.load %arg12[%c7_151, %c0_152] : memref<32x32xf32, #tpu.memory_space<vmem>>, vector<16x32xf32>
    %c11 = arith.constant 11 : index
    %c0_153 = arith.constant 0 : index
    %c0_154 = arith.constant 0 : index
    %185 = vector.load %arg3[%c11, %c0_153, %c0_154] : memref<25x32x32xf32, #tpu.memory_space<vmem>>, vector<1x32x32xf32>
    %186 = vector.shape_cast %185 : vector<1x32x32xf32> to vector<32x32xf32>
    %cst_155 = arith.constant dense<0.000000e+00> : vector<16x32xf32>
    %187 = tpu.matmul %184, %186, %cst_155 {dimension_numbers = #tpu.dot_dimension_numbers<[1], [0], [0], [1], [0, 0, 1, 1], [], []>} : vector<16x32xf32>, vector<32x32xf32>, vector<16x32xf32> -> vector<16x32xf32>
    %188 = arith.addf %183, %187 : vector<16x32xf32>
    %c8_156 = arith.constant 8 : index
    %c0_157 = arith.constant 0 : index
    %189 = vector.load %arg12[%c8_156, %c0_157] : memref<32x32xf32, #tpu.memory_space<vmem>>, vector<16x32xf32>
    %c12 = arith.constant 12 : index
    %c0_158 = arith.constant 0 : index
    %c0_159 = arith.constant 0 : index
    %190 = vector.load %arg3[%c12, %c0_158, %c0_159] : memref<25x32x32xf32, #tpu.memory_space<vmem>>, vector<1x32x32xf32>
    %191 = vector.shape_cast %190 : vector<1x32x32xf32> to vector<32x32xf32>
    %cst_160 = arith.constant dense<0.000000e+00> : vector<16x32xf32>
    %192 = tpu.matmul %189, %191, %cst_160 {dimension_numbers = #tpu.dot_dimension_numbers<[1], [0], [0], [1], [0, 0, 1, 1], [], []>} : vector<16x32xf32>, vector<32x32xf32>, vector<16x32xf32> -> vector<16x32xf32>
    %193 = arith.addf %188, %192 : vector<16x32xf32>
    %c9_161 = arith.constant 9 : index
    %c0_162 = arith.constant 0 : index
    %194 = vector.load %arg12[%c9_161, %c0_162] : memref<32x32xf32, #tpu.memory_space<vmem>>, vector<16x32xf32>
    %c13 = arith.constant 13 : index
    %c0_163 = arith.constant 0 : index
    %c0_164 = arith.constant 0 : index
    %195 = vector.load %arg3[%c13, %c0_163, %c0_164] : memref<25x32x32xf32, #tpu.memory_space<vmem>>, vector<1x32x32xf32>
    %196 = vector.shape_cast %195 : vector<1x32x32xf32> to vector<32x32xf32>
    %cst_165 = arith.constant dense<0.000000e+00> : vector<16x32xf32>
    %197 = tpu.matmul %194, %196, %cst_165 {dimension_numbers = #tpu.dot_dimension_numbers<[1], [0], [0], [1], [0, 0, 1, 1], [], []>} : vector<16x32xf32>, vector<32x32xf32>, vector<16x32xf32> -> vector<16x32xf32>
    %198 = arith.addf %193, %197 : vector<16x32xf32>
    %c10_166 = arith.constant 10 : index
    %c0_167 = arith.constant 0 : index
    %199 = vector.load %arg12[%c10_166, %c0_167] : memref<32x32xf32, #tpu.memory_space<vmem>>, vector<16x32xf32>
    %c14 = arith.constant 14 : index
    %c0_168 = arith.constant 0 : index
    %c0_169 = arith.constant 0 : index
    %200 = vector.load %arg3[%c14, %c0_168, %c0_169] : memref<25x32x32xf32, #tpu.memory_space<vmem>>, vector<1x32x32xf32>
    %201 = vector.shape_cast %200 : vector<1x32x32xf32> to vector<32x32xf32>
    %cst_170 = arith.constant dense<0.000000e+00> : vector<16x32xf32>
    %202 = tpu.matmul %199, %201, %cst_170 {dimension_numbers = #tpu.dot_dimension_numbers<[1], [0], [0], [1], [0, 0, 1, 1], [], []>} : vector<16x32xf32>, vector<32x32xf32>, vector<16x32xf32> -> vector<16x32xf32>
    %203 = arith.addf %198, %202 : vector<16x32xf32>
    %204 = vector.broadcast %177 : vector<1x32xf32> to vector<16x32xf32>
    %205 = arith.addf %203, %204 : vector<16x32xf32>
    %cst_171 = arith.constant dense<0.000000e+00> : vector<16xf32>
    %206 = vector.multi_reduction <add>, %205, %cst_171 [1] : vector<16x32xf32> to vector<16xf32>
    %207 = vector.shape_cast %206 : vector<16xf32> to vector<16x1xf32>
    %cst_172 = arith.constant 3.200000e+01 : f32
    %208 = vector.broadcast %cst_172 : f32 to vector<16x1xf32>
    %209 = arith.divf %207, %208 : vector<16x1xf32>
    %210 = arith.mulf %205, %205 : vector<16x32xf32>
    %cst_173 = arith.constant dense<0.000000e+00> : vector<16xf32>
    %211 = vector.multi_reduction <add>, %210, %cst_173 [1] : vector<16x32xf32> to vector<16xf32>
    %212 = vector.shape_cast %211 : vector<16xf32> to vector<16x1xf32>
    %cst_174 = arith.constant 3.200000e+01 : f32
    %213 = vector.broadcast %cst_174 : f32 to vector<16x1xf32>
    %214 = arith.divf %212, %213 : vector<16x1xf32>
    %215 = arith.mulf %209, %209 : vector<16x1xf32>
    %216 = arith.subf %214, %215 : vector<16x1xf32>
    %cst_175 = arith.constant 9.99999974E-6 : f32
    %217 = vector.broadcast %cst_175 : f32 to vector<16x1xf32>
    %218 = arith.addf %216, %217 : vector<16x1xf32>
    %219 = math.rsqrt %218 : vector<16x1xf32>
    %220 = vector.broadcast %219 : vector<16x1xf32> to vector<16x32xf32>
    %221 = vector.broadcast %178 : vector<1x32xf32> to vector<16x32xf32>
    %222 = arith.mulf %220, %221 : vector<16x32xf32>
    %223 = arith.mulf %205, %222 : vector<16x32xf32>
    %224 = vector.broadcast %209 : vector<16x1xf32> to vector<16x32xf32>
    %225 = arith.mulf %224, %222 : vector<16x32xf32>
    %226 = vector.broadcast %179 : vector<1x32xf32> to vector<16x32xf32>
    %227 = arith.subf %226, %225 : vector<16x32xf32>
    %228 = arith.addf %223, %227 : vector<16x32xf32>
    %cst_176 = arith.constant 0.000000e+00 : f32
    %229 = vector.broadcast %cst_176 : f32 to vector<16x32xf32>
    %230 = arith.maximumf %228, %229 : vector<16x32xf32>
    %c8_177 = arith.constant 8 : index
    %c0_178 = arith.constant 0 : index
    %231 = vector.load %arg13[%c8_177, %c0_178] : memref<32x32xf32, #tpu.memory_space<vmem>>, vector<16x32xf32>
    tpu.vector_store %arg13[%c8_177, %c0_178], %230 {strides = array<i32>} : memref<32x32xf32, #tpu.memory_space<vmem>>, vector<16x32xf32>,
    %c4_179 = arith.constant 4 : index
    %c0_180 = arith.constant 0 : index
    %232 = vector.load %arg4[%c4_179, %c0_180] : memref<6x32xf32, #tpu.memory_space<vmem>>, vector<1x32xf32>
    %c4_181 = arith.constant 4 : index
    %c0_182 = arith.constant 0 : index
    %233 = vector.load %arg5[%c4_181, %c0_182] : memref<6x32xf32, #tpu.memory_space<vmem>>, vector<1x32xf32>
    %c4_183 = arith.constant 4 : index
    %c0_184 = arith.constant 0 : index
    %234 = vector.load %arg6[%c4_183, %c0_184] : memref<6x32xf32, #tpu.memory_space<vmem>>, vector<1x32xf32>
    %c6_185 = arith.constant 6 : index
    %c0_186 = arith.constant 0 : index
    %235 = vector.load %arg13[%c6_185, %c0_186] : memref<32x32xf32, #tpu.memory_space<vmem>>, vector<16x32xf32>
    %c15 = arith.constant 15 : index
    %c0_187 = arith.constant 0 : index
    %c0_188 = arith.constant 0 : index
    %236 = vector.load %arg3[%c15, %c0_187, %c0_188] : memref<25x32x32xf32, #tpu.memory_space<vmem>>, vector<1x32x32xf32>
    %237 = vector.shape_cast %236 : vector<1x32x32xf32> to vector<32x32xf32>
    %cst_189 = arith.constant dense<0.000000e+00> : vector<16x32xf32>
    %238 = tpu.matmul %235, %237, %cst_189 {dimension_numbers = #tpu.dot_dimension_numbers<[1], [0], [0], [1], [0, 0, 1, 1], [], []>} : vector<16x32xf32>, vector<32x32xf32>, vector<16x32xf32> -> vector<16x32xf32>
    %c7_190 = arith.constant 7 : index
    %c0_191 = arith.constant 0 : index
    %239 = vector.load %arg13[%c7_190, %c0_191] : memref<32x32xf32, #tpu.memory_space<vmem>>, vector<16x32xf32>
    %c16 = arith.constant 16 : index
    %c0_192 = arith.constant 0 : index
    %c0_193 = arith.constant 0 : index
    %240 = vector.load %arg3[%c16, %c0_192, %c0_193] : memref<25x32x32xf32, #tpu.memory_space<vmem>>, vector<1x32x32xf32>
    %241 = vector.shape_cast %240 : vector<1x32x32xf32> to vector<32x32xf32>
    %cst_194 = arith.constant dense<0.000000e+00> : vector<16x32xf32>
    %242 = tpu.matmul %239, %241, %cst_194 {dimension_numbers = #tpu.dot_dimension_numbers<[1], [0], [0], [1], [0, 0, 1, 1], [], []>} : vector<16x32xf32>, vector<32x32xf32>, vector<16x32xf32> -> vector<16x32xf32>
    %243 = arith.addf %238, %242 : vector<16x32xf32>
    %c8_195 = arith.constant 8 : index
    %c0_196 = arith.constant 0 : index
    %244 = vector.load %arg13[%c8_195, %c0_196] : memref<32x32xf32, #tpu.memory_space<vmem>>, vector<16x32xf32>
    %c17 = arith.constant 17 : index
    %c0_197 = arith.constant 0 : index
    %c0_198 = arith.constant 0 : index
    %245 = vector.load %arg3[%c17, %c0_197, %c0_198] : memref<25x32x32xf32, #tpu.memory_space<vmem>>, vector<1x32x32xf32>
    %246 = vector.shape_cast %245 : vector<1x32x32xf32> to vector<32x32xf32>
    %cst_199 = arith.constant dense<0.000000e+00> : vector<16x32xf32>
    %247 = tpu.matmul %244, %246, %cst_199 {dimension_numbers = #tpu.dot_dimension_numbers<[1], [0], [0], [1], [0, 0, 1, 1], [], []>} : vector<16x32xf32>, vector<32x32xf32>, vector<16x32xf32> -> vector<16x32xf32>
    %248 = arith.addf %243, %247 : vector<16x32xf32>
    %c9_200 = arith.constant 9 : index
    %c0_201 = arith.constant 0 : index
    %249 = vector.load %arg13[%c9_200, %c0_201] : memref<32x32xf32, #tpu.memory_space<vmem>>, vector<16x32xf32>
    %c18 = arith.constant 18 : index
    %c0_202 = arith.constant 0 : index
    %c0_203 = arith.constant 0 : index
    %250 = vector.load %arg3[%c18, %c0_202, %c0_203] : memref<25x32x32xf32, #tpu.memory_space<vmem>>, vector<1x32x32xf32>
    %251 = vector.shape_cast %250 : vector<1x32x32xf32> to vector<32x32xf32>
    %cst_204 = arith.constant dense<0.000000e+00> : vector<16x32xf32>
    %252 = tpu.matmul %249, %251, %cst_204 {dimension_numbers = #tpu.dot_dimension_numbers<[1], [0], [0], [1], [0, 0, 1, 1], [], []>} : vector<16x32xf32>, vector<32x32xf32>, vector<16x32xf32> -> vector<16x32xf32>
    %253 = arith.addf %248, %252 : vector<16x32xf32>
    %c10_205 = arith.constant 10 : index
    %c0_206 = arith.constant 0 : index
    %254 = vector.load %arg13[%c10_205, %c0_206] : memref<32x32xf32, #tpu.memory_space<vmem>>, vector<16x32xf32>
    %c19 = arith.constant 19 : index
    %c0_207 = arith.constant 0 : index
    %c0_208 = arith.constant 0 : index
    %255 = vector.load %arg3[%c19, %c0_207, %c0_208] : memref<25x32x32xf32, #tpu.memory_space<vmem>>, vector<1x32x32xf32>
    %256 = vector.shape_cast %255 : vector<1x32x32xf32> to vector<32x32xf32>
    %cst_209 = arith.constant dense<0.000000e+00> : vector<16x32xf32>
    %257 = tpu.matmul %254, %256, %cst_209 {dimension_numbers = #tpu.dot_dimension_numbers<[1], [0], [0], [1], [0, 0, 1, 1], [], []>} : vector<16x32xf32>, vector<32x32xf32>, vector<16x32xf32> -> vector<16x32xf32>
    %258 = arith.addf %253, %257 : vector<16x32xf32>
    %259 = vector.broadcast %232 : vector<1x32xf32> to vector<16x32xf32>
    %260 = arith.addf %258, %259 : vector<16x32xf32>
    %cst_210 = arith.constant dense<0.000000e+00> : vector<16xf32>
    %261 = vector.multi_reduction <add>, %260, %cst_210 [1] : vector<16x32xf32> to vector<16xf32>
    %262 = vector.shape_cast %261 : vector<16xf32> to vector<16x1xf32>
    %cst_211 = arith.constant 3.200000e+01 : f32
    %263 = vector.broadcast %cst_211 : f32 to vector<16x1xf32>
    %264 = arith.divf %262, %263 : vector<16x1xf32>
    %265 = arith.mulf %260, %260 : vector<16x32xf32>
    %cst_212 = arith.constant dense<0.000000e+00> : vector<16xf32>
    %266 = vector.multi_reduction <add>, %265, %cst_212 [1] : vector<16x32xf32> to vector<16xf32>
    %267 = vector.shape_cast %266 : vector<16xf32> to vector<16x1xf32>
    %cst_213 = arith.constant 3.200000e+01 : f32
    %268 = vector.broadcast %cst_213 : f32 to vector<16x1xf32>
    %269 = arith.divf %267, %268 : vector<16x1xf32>
    %270 = arith.mulf %264, %264 : vector<16x1xf32>
    %271 = arith.subf %269, %270 : vector<16x1xf32>
    %cst_214 = arith.constant 9.99999974E-6 : f32
    %272 = vector.broadcast %cst_214 : f32 to vector<16x1xf32>
    %273 = arith.addf %271, %272 : vector<16x1xf32>
    %274 = math.rsqrt %273 : vector<16x1xf32>
    %275 = vector.broadcast %274 : vector<16x1xf32> to vector<16x32xf32>
    %276 = vector.broadcast %233 : vector<1x32xf32> to vector<16x32xf32>
    %277 = arith.mulf %275, %276 : vector<16x32xf32>
    %278 = arith.mulf %260, %277 : vector<16x32xf32>
    %279 = vector.broadcast %264 : vector<16x1xf32> to vector<16x32xf32>
    %280 = arith.mulf %279, %277 : vector<16x32xf32>
    %281 = vector.broadcast %234 : vector<1x32xf32> to vector<16x32xf32>
    %282 = arith.subf %281, %280 : vector<16x32xf32>
    %283 = arith.addf %278, %282 : vector<16x32xf32>
    %cst_215 = arith.constant 0.000000e+00 : f32
    %284 = vector.broadcast %cst_215 : f32 to vector<16x32xf32>
    %285 = arith.maximumf %283, %284 : vector<16x32xf32>
    %c8_216 = arith.constant 8 : index
    %c0_217 = arith.constant 0 : index
    %286 = vector.load %arg12[%c8_216, %c0_217] : memref<32x32xf32, #tpu.memory_space<vmem>>, vector<16x32xf32>
    tpu.vector_store %arg12[%c8_216, %c0_217], %285 {strides = array<i32>} : memref<32x32xf32, #tpu.memory_space<vmem>>, vector<16x32xf32>,
    %c5_218 = arith.constant 5 : index
    %c0_219 = arith.constant 0 : index
    %287 = vector.load %arg4[%c5_218, %c0_219] : memref<6x32xf32, #tpu.memory_space<vmem>>, vector<1x32xf32>
    %c5_220 = arith.constant 5 : index
    %c0_221 = arith.constant 0 : index
    %288 = vector.load %arg5[%c5_220, %c0_221] : memref<6x32xf32, #tpu.memory_space<vmem>>, vector<1x32xf32>
    %c5_222 = arith.constant 5 : index
    %c0_223 = arith.constant 0 : index
    %289 = vector.load %arg6[%c5_222, %c0_223] : memref<6x32xf32, #tpu.memory_space<vmem>>, vector<1x32xf32>
    %c6_224 = arith.constant 6 : index
    %c0_225 = arith.constant 0 : index
    %290 = vector.load %arg12[%c6_224, %c0_225] : memref<32x32xf32, #tpu.memory_space<vmem>>, vector<16x32xf32>
    %c20 = arith.constant 20 : index
    %c0_226 = arith.constant 0 : index
    %c0_227 = arith.constant 0 : index
    %291 = vector.load %arg3[%c20, %c0_226, %c0_227] : memref<25x32x32xf32, #tpu.memory_space<vmem>>, vector<1x32x32xf32>
    %292 = vector.shape_cast %291 : vector<1x32x32xf32> to vector<32x32xf32>
    %cst_228 = arith.constant dense<0.000000e+00> : vector<16x32xf32>
    %293 = tpu.matmul %290, %292, %cst_228 {dimension_numbers = #tpu.dot_dimension_numbers<[1], [0], [0], [1], [0, 0, 1, 1], [], []>} : vector<16x32xf32>, vector<32x32xf32>, vector<16x32xf32> -> vector<16x32xf32>
    %c7_229 = arith.constant 7 : index
    %c0_230 = arith.constant 0 : index
    %294 = vector.load %arg12[%c7_229, %c0_230] : memref<32x32xf32, #tpu.memory_space<vmem>>, vector<16x32xf32>
    %c21 = arith.constant 21 : index
    %c0_231 = arith.constant 0 : index
    %c0_232 = arith.constant 0 : index
    %295 = vector.load %arg3[%c21, %c0_231, %c0_232] : memref<25x32x32xf32, #tpu.memory_space<vmem>>, vector<1x32x32xf32>
    %296 = vector.shape_cast %295 : vector<1x32x32xf32> to vector<32x32xf32>
    %cst_233 = arith.constant dense<0.000000e+00> : vector<16x32xf32>
    %297 = tpu.matmul %294, %296, %cst_233 {dimension_numbers = #tpu.dot_dimension_numbers<[1], [0], [0], [1], [0, 0, 1, 1], [], []>} : vector<16x32xf32>, vector<32x32xf32>, vector<16x32xf32> -> vector<16x32xf32>
    %298 = arith.addf %293, %297 : vector<16x32xf32>
    %c8_234 = arith.constant 8 : index
    %c0_235 = arith.constant 0 : index
    %299 = vector.load %arg12[%c8_234, %c0_235] : memref<32x32xf32, #tpu.memory_space<vmem>>, vector<16x32xf32>
    %c22 = arith.constant 22 : index
    %c0_236 = arith.constant 0 : index
    %c0_237 = arith.constant 0 : index
    %300 = vector.load %arg3[%c22, %c0_236, %c0_237] : memref<25x32x32xf32, #tpu.memory_space<vmem>>, vector<1x32x32xf32>
    %301 = vector.shape_cast %300 : vector<1x32x32xf32> to vector<32x32xf32>
    %cst_238 = arith.constant dense<0.000000e+00> : vector<16x32xf32>
    %302 = tpu.matmul %299, %301, %cst_238 {dimension_numbers = #tpu.dot_dimension_numbers<[1], [0], [0], [1], [0, 0, 1, 1], [], []>} : vector<16x32xf32>, vector<32x32xf32>, vector<16x32xf32> -> vector<16x32xf32>
    %303 = arith.addf %298, %302 : vector<16x32xf32>
    %c9_239 = arith.constant 9 : index
    %c0_240 = arith.constant 0 : index
    %304 = vector.load %arg12[%c9_239, %c0_240] : memref<32x32xf32, #tpu.memory_space<vmem>>, vector<16x32xf32>
    %c23 = arith.constant 23 : index
    %c0_241 = arith.constant 0 : index
    %c0_242 = arith.constant 0 : index
    %305 = vector.load %arg3[%c23, %c0_241, %c0_242] : memref<25x32x32xf32, #tpu.memory_space<vmem>>, vector<1x32x32xf32>
    %306 = vector.shape_cast %305 : vector<1x32x32xf32> to vector<32x32xf32>
    %cst_243 = arith.constant dense<0.000000e+00> : vector<16x32xf32>
    %307 = tpu.matmul %304, %306, %cst_243 {dimension_numbers = #tpu.dot_dimension_numbers<[1], [0], [0], [1], [0, 0, 1, 1], [], []>} : vector<16x32xf32>, vector<32x32xf32>, vector<16x32xf32> -> vector<16x32xf32>
    %308 = arith.addf %303, %307 : vector<16x32xf32>
    %c10_244 = arith.constant 10 : index
    %c0_245 = arith.constant 0 : index
    %309 = vector.load %arg12[%c10_244, %c0_245] : memref<32x32xf32, #tpu.memory_space<vmem>>, vector<16x32xf32>
    %c24_246 = arith.constant 24 : index
    %c0_247 = arith.constant 0 : index
    %c0_248 = arith.constant 0 : index
    %310 = vector.load %arg3[%c24_246, %c0_247, %c0_248] : memref<25x32x32xf32, #tpu.memory_space<vmem>>, vector<1x32x32xf32>
    %311 = vector.shape_cast %310 : vector<1x32x32xf32> to vector<32x32xf32>
    %cst_249 = arith.constant dense<0.000000e+00> : vector<16x32xf32>
    %312 = tpu.matmul %309, %311, %cst_249 {dimension_numbers = #tpu.dot_dimension_numbers<[1], [0], [0], [1], [0, 0, 1, 1], [], []>} : vector<16x32xf32>, vector<32x32xf32>, vector<16x32xf32> -> vector<16x32xf32>
    %313 = arith.addf %308, %312 : vector<16x32xf32>
    %314 = vector.broadcast %287 : vector<1x32xf32> to vector<16x32xf32>
    %315 = arith.addf %313, %314 : vector<16x32xf32>
    %cst_250 = arith.constant dense<0.000000e+00> : vector<16xf32>
    %316 = vector.multi_reduction <add>, %315, %cst_250 [1] : vector<16x32xf32> to vector<16xf32>
    %317 = vector.shape_cast %316 : vector<16xf32> to vector<16x1xf32>
    %cst_251 = arith.constant 3.200000e+01 : f32
    %318 = vector.broadcast %cst_251 : f32 to vector<16x1xf32>
    %319 = arith.divf %317, %318 : vector<16x1xf32>
    %320 = arith.mulf %315, %315 : vector<16x32xf32>
    %cst_252 = arith.constant dense<0.000000e+00> : vector<16xf32>
    %321 = vector.multi_reduction <add>, %320, %cst_252 [1] : vector<16x32xf32> to vector<16xf32>
    %322 = vector.shape_cast %321 : vector<16xf32> to vector<16x1xf32>
    %cst_253 = arith.constant 3.200000e+01 : f32
    %323 = vector.broadcast %cst_253 : f32 to vector<16x1xf32>
    %324 = arith.divf %322, %323 : vector<16x1xf32>
    %325 = arith.mulf %319, %319 : vector<16x1xf32>
    %326 = arith.subf %324, %325 : vector<16x1xf32>
    %cst_254 = arith.constant 9.99999974E-6 : f32
    %327 = vector.broadcast %cst_254 : f32 to vector<16x1xf32>
    %328 = arith.addf %326, %327 : vector<16x1xf32>
    %329 = math.rsqrt %328 : vector<16x1xf32>
    %330 = vector.broadcast %329 : vector<16x1xf32> to vector<16x32xf32>
    %331 = vector.broadcast %288 : vector<1x32xf32> to vector<16x32xf32>
    %332 = arith.mulf %330, %331 : vector<16x32xf32>
    %333 = arith.mulf %315, %332 : vector<16x32xf32>
    %334 = vector.broadcast %319 : vector<16x1xf32> to vector<16x32xf32>
    %335 = arith.mulf %334, %332 : vector<16x32xf32>
    %336 = vector.broadcast %289 : vector<1x32xf32> to vector<16x32xf32>
    %337 = arith.subf %336, %335 : vector<16x32xf32>
    %338 = arith.addf %333, %337 : vector<16x32xf32>
    %cst_255 = arith.constant 0.000000e+00 : f32
    %339 = vector.broadcast %cst_255 : f32 to vector<16x32xf32>
    %340 = arith.maximumf %338, %339 : vector<16x32xf32>
    %c8_256 = arith.constant 8 : index
    %c0_257 = arith.constant 0 : index
    %341 = vector.load %arg13[%c8_256, %c0_257] : memref<32x32xf32, #tpu.memory_space<vmem>>, vector<16x32xf32>
    tpu.vector_store %arg13[%c8_256, %c0_257], %340 {strides = array<i32>} : memref<32x32xf32, #tpu.memory_space<vmem>>, vector<16x32xf32>,
    %c8_258 = arith.constant 8 : index
    %c0_259 = arith.constant 0 : index
    %342 = vector.load %arg13[%c8_258, %c0_259] : memref<32x32xf32, #tpu.memory_space<vmem>>, vector<16x32xf32>
    %c0_260 = arith.constant 0 : index
    %c0_261 = arith.constant 0 : index
    %343 = vector.load %arg7[%c0_260, %c0_261] : memref<32x16xf32, #tpu.memory_space<vmem>>, vector<32x16xf32>
    %cst_262 = arith.constant dense<0.000000e+00> : vector<16x16xf32>
    %344 = tpu.matmul %342, %343, %cst_262 {dimension_numbers = #tpu.dot_dimension_numbers<[1], [0], [0], [1], [0, 0, 1, 1], [], []>} : vector<16x32xf32>, vector<32x16xf32>, vector<16x16xf32> -> vector<16x16xf32>
    %c0_263 = arith.constant 0 : index
    %c0_264 = arith.constant 0 : index
    %345 = vector.load %arg8[%c0_263, %c0_264] : memref<1x16xf32, #tpu.memory_space<vmem>>, vector<1x16xf32>
    %346 = vector.broadcast %345 : vector<1x16xf32> to vector<16x16xf32>
    %347 = arith.addf %344, %346 : vector<16x16xf32>
    %348 = vector.extract_strided_slice %347 {offsets = [0, 0], sizes = [16, 8], strides = [1, 1]} : vector<16x16xf32> to vector<16x8xf32>
    %349 = vector.extract_strided_slice %347 {offsets = [0, 8], sizes = [16, 8], strides = [1, 1]} : vector<16x16xf32> to vector<16x8xf32>
    %cst_265 = arith.constant 5.000000e-01 : f32
    %350 = vector.broadcast %cst_265 : f32 to vector<16x8xf32>
    %351 = arith.mulf %350, %349 : vector<16x8xf32>
    %352 = math.exp %351 : vector<16x8xf32>
    %c0_266 = arith.constant 0 : index
    %c0_267 = arith.constant 0 : index
    %c0_268 = arith.constant 0 : index
    %353 = vector.load %arg9[%c0_266, %c0_267, %c0_268] : memref<1x16x8xf32, #tpu.memory_space<vmem>>, vector<1x16x8xf32>
    %354 = vector.shape_cast %353 : vector<1x16x8xf32> to vector<16x8xf32>
    %355 = arith.mulf %352, %354 : vector<16x8xf32>
    %356 = arith.addf %348, %355 : vector<16x8xf32>
    %c0_269 = arith.constant 0 : index
    %c0_270 = arith.constant 0 : index
    %c0_271 = arith.constant 0 : index
    %357 = vector.load %arg10[%c0_269, %c0_270, %c0_271] : memref<1x16x24xf32, #tpu.memory_space<vmem>>, vector<1x16x16xf32>
    %358 = vector.shape_cast %357 : vector<1x16x16xf32> to vector<16x16xf32>
    %359 = vector.shape_cast %347 : vector<16x16xf32> to vector<1x16x16xf32>
    tpu.vector_store %arg10[%c0_269, %c0_270, %c0_271], %359 {strides = array<i32>} : memref<1x16x24xf32, #tpu.memory_space<vmem>>, vector<1x16x16xf32>,
    %c0_272 = arith.constant 0 : index
    %c0_273 = arith.constant 0 : index
    %c16_274 = arith.constant 16 : index
    %360 = vector.load %arg10[%c0_272, %c0_273, %c16_274] : memref<1x16x24xf32, #tpu.memory_space<vmem>>, vector<1x16x8xf32>
    %361 = vector.shape_cast %360 : vector<1x16x8xf32> to vector<16x8xf32>
    %362 = vector.shape_cast %356 : vector<16x8xf32> to vector<1x16x8xf32>
    tpu.vector_store %arg10[%c0_272, %c0_273, %c16_274], %362 {strides = array<i32>} : memref<1x16x24xf32, #tpu.memory_space<vmem>>, vector<1x16x8xf32>,
    return
  }
  func.func @transform_0(%arg0: i32) -> (i32, i32, i32) {
    %c0_i32 = arith.constant 0 : i32
    %c0_i32_0 = arith.constant 0 : i32
    %c0_i32_1 = arith.constant 0 : i32
    return %arg0, %c0_i32, %c0_i32_0 : i32, i32, i32
  }
  func.func @transform_1(%arg0: i32) -> (i32, i32, i32) {
    %c0_i32 = arith.constant 0 : i32
    %c0_i32_0 = arith.constant 0 : i32
    %c0_i32_1 = arith.constant 0 : i32
    %c0_i32_2 = arith.constant 0 : i32
    return %c0_i32, %c0_i32_0, %c0_i32_1 : i32, i32, i32
  }
  func.func @transform_2(%arg0: i32) -> (i32, i32, i32) {
    %c0_i32 = arith.constant 0 : i32
    %c0_i32_0 = arith.constant 0 : i32
    %c0_i32_1 = arith.constant 0 : i32
    %c0_i32_2 = arith.constant 0 : i32
    return %c0_i32, %c0_i32_0, %c0_i32_1 : i32, i32, i32
  }
  func.func @transform_3(%arg0: i32) -> (i32, i32) {
    %c0_i32 = arith.constant 0 : i32
    %c0_i32_0 = arith.constant 0 : i32
    %c0_i32_1 = arith.constant 0 : i32
    return %c0_i32, %c0_i32_0 : i32, i32
  }
  func.func @transform_4(%arg0: i32) -> (i32, i32) {
    %c0_i32 = arith.constant 0 : i32
    %c0_i32_0 = arith.constant 0 : i32
    %c0_i32_1 = arith.constant 0 : i32
    return %c0_i32, %c0_i32_0 : i32, i32
  }
  func.func @transform_5(%arg0: i32) -> (i32, i32) {
    %c0_i32 = arith.constant 0 : i32
    %c0_i32_0 = arith.constant 0 : i32
    %c0_i32_1 = arith.constant 0 : i32
    return %c0_i32, %c0_i32_0 : i32, i32
  }
  func.func @transform_6(%arg0: i32) -> (i32, i32) {
    %c0_i32 = arith.constant 0 : i32
    %c0_i32_0 = arith.constant 0 : i32
    %c0_i32_1 = arith.constant 0 : i32
    return %c0_i32, %c0_i32_0 : i32, i32
  }
  func.func @transform_7(%arg0: i32) -> (i32, i32) {
    %c0_i32 = arith.constant 0 : i32
    %c0_i32_0 = arith.constant 0 : i32
    %c0_i32_1 = arith.constant 0 : i32
    return %c0_i32, %c0_i32_0 : i32, i32
  }
  func.func @transform_8(%arg0: i32) -> (i32, i32, i32) {
    %c0_i32 = arith.constant 0 : i32
    %c0_i32_0 = arith.constant 0 : i32
    %c0_i32_1 = arith.constant 0 : i32
    return %arg0, %c0_i32, %c0_i32_0 : i32, i32, i32
  }
  func.func @transform_9(%arg0: i32) -> (i32, i32, i32) {
    %c0_i32 = arith.constant 0 : i32
    %c0_i32_0 = arith.constant 0 : i32
    %c0_i32_1 = arith.constant 0 : i32
    return %arg0, %c0_i32, %c0_i32_0 : i32, i32, i32
  }
}

</mosaic_0001>

<bundles_post_ra>
// kernel: posterior_encoder_forward.1
= control target key start
LH: loop header
LB: loop body
LE: loop exit
PB: predicated region body
PF: predicated region fallthrough
CT: control target
= control target key end

     0   :  { %14 = vsyncpa [#allocation6], 0  ;;  %s4906_s30 = smov 0   ;;  %s5307_s0 = inlined_call_operand.vmem [shape: f32[2,16,80], index: 0, kind: input, shape index: {}]   ;;  %s5308_s1 = inlined_call_operand.vmem [shape: f32[5,80,32], index: 1, kind: input, shape index: {}]   ;;  %s5309_s2 = inlined_call_operand.hbm [shape: f32[25,32,32], index: 2, kind: input, shape index: {}]   ;;  %s5310_s3 = inlined_call_operand.vmem [shape: f32[6,32], index: 3, kind: input, shape index: {}]   ;;  %s5311_s4 = inlined_call_operand.vmem [shape: f32[6,32], index: 4, kind: input, shape index: {}]   ;;  %s5312_s5 = inlined_call_operand.vmem [shape: f32[6,32], index: 5, kind: input, shape index: {}]   ;;  %s5313_s6 = inlined_call_operand.vmem [shape: f32[32,16], index: 6, kind: input, shape index: {}]   ;;  %s5314_s7 = inlined_call_operand.vmem [shape: f32[1,16], index: 7, kind: input, shape index: {}]   ;;  %s5315_s8 = inlined_call_operand.vmem [shape: f32[2,16,8], index: 8, kind: input, shape index: {}]   ;;  %s5316_s9 = inlined_call_operand.vmem [shape: f32[2,16,24], index: 9, kind: output, shape index: {}]  }
   0x1 LB: > { %s4912_s10 = sadd.s32 4294967295, %s4847_s30   ;;  %p3646_p0 = scmp.ge.s32.totalorder %s4847_s30, 1  ;;  %s4847_s30 = sphi %s4906_s30, %s20_s30  }
   0x2   : > { %p250_p1 = scmp.lt.s32.totalorder %s4847_s30, 3  ;;  %s4849_s11 = smov [#allocation5]  }
   0x3   : > { %s265_s12 = sshll.u32 %s4849_s11, 4  ;;  %p5317_p3 = scmp.eq.s32.totalorder %s4912_s10, 0  ;;  %s266_s12 = int_to_ptr.vmem [resolvable:$true] %s265_s12 }
   0x4   : > { %p4916_p2 = pnand %p3646_p0, %p250_p1  ;;  %s4809_s17 = scalar_lea.hbm %s5309_s2, 12800 }
   0x5   : > { %p4810_p6 = scmp.ne.s32.totalorder %s5309_s2, %s4809_s17  ;;  %p4816_p10 = scmp.lt.u32.totalorder %s4809_s17, %s5309_s2 }
   0x6   : > { %s5319_s13 = scalar_select %p4916_p2, 1, 0 }
   0x7   : > { %p4760_p4 = pneg %p4916_p2 }
   0x9   : > { %p4925_p5 = pnand %p5317_p3, %p4760_p4 }
   0xb   : > { %p4811_p7 = pneg %p4925_p5 }
   0xd   : > { %p4812_p8 = pnand %p4811_p7, %p4810_p6 }
   0xf   : > { %p4813_p9 = pneg %p4812_p8 }
  0x11   : > { %p4818_p11 = pnand %p4816_p10, %p4813_p9 }
  0x13   : > { %4821 = shalt.err (!%p4818_p11)
}
  0x14   : > { %s4822_s22 = scalar_lea.vmem %s266_s12, 12800  ;;  %p4830_p1 = scmp.lt.s32.totalorder %s266_s12, %s266_s12 }
  0x15   : > { %p4823_p12 = scmp.ne.s32.totalorder %s266_s12, %s4822_s22  ;;  %p4831_p4 = scmp.lt.s32.totalorder %s4822_s22, %s4822_s22 }
  0x17   : > { %p4825_p13 = pnand %p4823_p12, %p4811_p7  ;;  %p4832_p3 = por %p4831_p4, %p4830_p1 }
  0x19   : > { %p4826_p0 = pneg %p4825_p13 }
  0x1b   : > { %p4833_p2 = pnand %p4832_p3, %p4826_p0 }
  0x1d   : > { %4836 = shalt.err (!%p4833_p2)
}
  0x1e   : > { %s4850_s23 = smov 128   ;;  %s4851_s24 = smov 8  }
  0x1f   : > { %4763 = dma.hbm_to_vmem [thread:$0]  (!%p4925_p5), %s5309_s2, 12800, %s266_s12, [#allocation6], %s4850_s23, %s4850_s23, %s4851_s24  }
  0x20   : > { %p5321_p6 = scmp.ne.s32.totalorder %s5319_s13, 0 }
  0x21   : > { %p5322_p8 = scmp.eq.s32.totalorder (!%p5321_p6), %s4912_s10, 0 }
  0x22   : > { %312 = sbr.rel (%p5321_p6) target bundleno = 3158 (0xc56), region = 56 }
  0x29   : > { %4842 = dma.done.wait (%p5322_p8), [#allocation6], 12800   ;;  %p5323_p7 = pmov %p5322_p8 }
  0x2a   : > { %p353_p2 = scmp.lt.s32.totalorder %s4912_s10, 1  ;;  %vm368_vm0 = vcmask 648192   ;;  %v4852_v0 = vmov 0.0   ;;  %v3657_v1 = vld [vmem:[%s5308_s1 + $0x50] sm:$0xff]  ;;  %v3658_v2 = vld [vmem:[%s5308_s1 + $0x58] sm:$0xff]  ;;  %v3659_v3 = vld [vmem:[%s5308_s1 + $0x60] sm:$0xff] }
  0x2b   : > { %4844 = vsyncadd (%p5323_p7), [#allocation6], 4294954496  ;;  %369 = vst.msk [vmem:[#allocation2 + $0x6] sm:$0x3] %vm368_vm0, %v4852_v0  ;;  %v4400_v4 = vpack.c.bf16 %v3658_v2, %v3657_v1  ;;  %v3660_v5 = vld [vmem:[%s5308_s1 + $0x68] sm:$0xff]  ;;  %vm378_vm1 = vcmask 654336  }
  0x2c   : > { %370 = vst.msk [vmem:[#allocation2 + $0x18] sm:$0x3] %vm368_vm0, %v4852_v0  ;;  %s5325_s10 = smov (!%p353_p2, %s4912_s10), 1  ;;  %v4404_v6 = vpack.c.bf16 %v3660_v5, %v3659_v3  ;;  %v3661_v7 = vld [vmem:[%s5308_s1 + $0x70] sm:$0xff]  ;;  %v3662_v8 = vld [vmem:[%s5308_s1 + $0x78] sm:$0xff]  ;;  %v3663_v12 = vld [vmem:[%s5308_s1 + $0x80] sm:$0xff] }
  0x2d   : > { %s4955_s27 = sshll.u32 %s5325_s10, 4  ;;  %4401 = vmatprep.subr.bf16.mxu0 %v4400_v4  ;;  %v4408_v11 = vpack.c.bf16 %v3662_v8, %v3661_v7  ;;  %v3664_v13 = vld [vmem:[%s5308_s1 + $0x88] sm:$0xff]  ;;  %v3665_v15 = vld [vmem:[%s5308_s1 + $0x90] sm:$0xff]  ;;  %v3666_v16 = vld [vmem:[%s5308_s1 + $0x98] sm:$0xff]  ;;  %vm865_vm2 = vcmask 261120   ;;  %vm371_vm3 = vcmask 254976  }
  0x2e   : > { %s357_s17 = scalar_lea.vmem %s5307_s0, %s4955_s27  ;;  %4403 = vmatpush3.bf16.msra.mxu0 %v4400_v4  ;;  %v4412_v14 = vpack.c.bf16 %v3664_v13, %v3663_v12  ;;  %v4416_v18 = vpack.c.bf16 %v3666_v16, %v3665_v15  ;;  %v386_v19 = vld [vmem:[%s5308_s1] sm:$0xff]  ;;  %v387_v20 = vld [vmem:[%s5308_s1 + $0x8] sm:$0xff]  ;;  %v388_v22 = vld [vmem:[%s5308_s1 + $0x10] sm:$0xff]  ;;  %372 = vst.msk [vmem:[#allocation3 + $0x6] sm:$0x3] %vm371_vm3, %v4852_v0  ;;  %s362_s20 = scalar_lea.vmem %s5315_s8, %s4955_s27  ;;  %vm3551_vm4 = vcmask 130048  }
  0x2f   : > { %v376_v9 = vld [vmem:[%s357_s17] sm:$0xff]  ;;  %v377_v10 = vld [vmem:[%s357_s17 + $0x8] sm:$0xff]  ;;  %4405 = vmatprep.subr.bf16.mxu0 %v4404_v6  ;;  %v4420_v21 = vpack.c.bf16 %v387_v20, %v386_v19  ;;  %v389_v23 = vld [vmem:[%s5308_s1 + $0x18] sm:$0xff]  ;;  %373 = vst.msk [vmem:[#allocation3 + $0x18] sm:$0x3] %vm371_vm3, %v4852_v0  ;;  %s4853_s21 = smov 8   ;;  %s5298_s12 = scalar_lea.vmem %s5316_s9, %s4955_s27 }
  0x30   : > { %379 = vst.msk [vmem:[#allocation2 + $0x8] sm:$0xff] %vm378_vm1, %v376_v9  ;;  %380 = vst.msk [vmem:[#allocation2 + $0x10] sm:$0xff] %vm378_vm1, %v377_v10  ;;  %v4424_v25 = vpack.c.bf16 %v389_v23, %v388_v22  ;;  %v390_v27 = vld [vmem:[%s5308_s1 + $0x20] sm:$0xff]  ;;  %v391_v28 = vld [vmem:[%s5308_s1 + $0x28] sm:$0xff]  ;;  %s4854_s27 = smov 120   ;;  %s4855_s13 = smov 16  }
  0x31   : > { %v4428_v29 = vpack.c.bf16 %v391_v28, %v390_v27  ;;  %v392_v30 = vld [vmem:[%s5308_s1 + $0x30] sm:$0xff]  ;;  %v393_v31 = vld [vmem:[%s5308_s1 + $0x38] sm:$0xff]  ;;  %v394_v33 = vld [vmem:[%s5308_s1 + $0x40] sm:$0xff]  ;;  %374 = vst.msk [vmem:[#allocation4 + $0x6] sm:$0x3] %vm371_vm3, %v4852_v0  ;;  %vm3562_vm5 = vcmask 195712  }
  0x32   : > { %4407 = vmatpush3.bf16.msra.mxu0 %v4404_v6  ;;  %v4432_v32 = vpack.c.bf16 %v393_v31, %v392_v30  ;;  %v395_v34 = vld [vmem:[%s5308_s1 + $0x48] sm:$0xff]  ;;  %v3671_v36 = vld [vmem:[%s5308_s1 + $0xa0] sm:$0xff]  ;;  %v3673_v39 = vld [vmem:[%s5308_s1 + $0xb0] sm:$0xff]  ;;  %375 = vst.msk [vmem:[#allocation4 + $0x18] sm:$0x3] %vm371_vm3, %v4852_v0 }
  0x33   : > { %4409 = vmatprep.subr.bf16.mxu0 %v4408_v11  ;;  %v4436_v35 = vpack.c.bf16 %v395_v34, %v394_v33  ;;  %v3672_v37 = vld [vmem:[%s5308_s1 + $0xa8] sm:$0xff]  ;;  %v3674_v40 = vld [vmem:[%s5308_s1 + $0xb8] sm:$0xff]  ;;  %v3675_v44 = vld [vmem:[%s5308_s1 + $0xc0] sm:$0xff] }
  0x34   : > { %v4440_v38 = vpack.c.bf16 %v3672_v37, %v3671_v36  ;;  %v4444_v42 = vpack.c.bf16 %v3674_v40, %v3673_v39  ;;  %v3676_v45 = vld [vmem:[%s5308_s1 + $0xc8] sm:$0xff]  ;;  %v3677_v47 = vld [vmem:[%s5308_s1 + $0xd0] sm:$0xff]  ;;  %v3678_v48 = vld [vmem:[%s5308_s1 + $0xd8] sm:$0xff] }
  0x35   : > { %v4448_v46 = vpack.c.bf16 %v3676_v45, %v3675_v44  ;;  %v4452_v49 = vpack.c.bf16 %v3678_v48, %v3677_v47  ;;  %v3679_v50 = vld [vmem:[%s5308_s1 + $0xe0] sm:$0xff]  ;;  %v3680_v51 = vld [vmem:[%s5308_s1 + $0xe8] sm:$0xff]  ;;  %v3683_v53 = vld [vmem:[%s5308_s1 + $0xf0] sm:$0xff] }
  0x36   : > { %4411 = vmatpush3.bf16.msra.mxu0 %v4408_v11  ;;  %v4456_v52 = vpack.c.bf16 %v3680_v51, %v3679_v50  ;;  %v3684_v54 = vld [vmem:[%s5308_s1 + $0xf8] sm:$0xff]  ;;  %v3685_v56 = vld [vmem:[%s5308_s1 + $0x100] sm:$0xff]  ;;  %v3686_v57 = vld [vmem:[%s5308_s1 + $0x108] sm:$0xff] }
  0x37   : > { %v396_v17 = vld [vmem:[#allocation2 + $0x7] sm:$0xff]  ;;  %4413 = vmatprep.subr.bf16.mxu0 %v4412_v14  ;;  %v397_v24 = vld [vmem:[#allocation2 + $0xf] sm:$0xff]  ;;  %v4460_v55 = vpack.c.bf16 %v3684_v54, %v3683_v53  ;;  %v4464_v59 = vpack.c.bf16 %v3686_v57, %v3685_v56  ;;  %v3688_v62 = vld [vmem:[%s5308_s1 + $0x118] sm:$0xff] }
  0x38   : > { %4019 = vmatprep.mubr.msk.f32.mxu0 %vm378_vm1, %v396_v17  ;;  %v384_v26 = vld [vmem:[#allocation2 + $0x6] sm:$0xff]  ;;  %v385_v41 = vld [vmem:[#allocation2 + $0xe] sm:$0xff]  ;;  %v3692_v5 = vld [vmem:[%s5308_s1 + $0x138] sm:$0xff] }
  0x39   : > { %v571_v43 = vld [vmem:[#allocation2 + $0x8] sm:$0xff]  ;;  %v572_v58 = vld [vmem:[#allocation2 + $0x10] sm:$0xff]  ;;  %v3689_v1 = vld [vmem:[%s5308_s1 + $0x120] sm:$0xff] }
  0x3a   : > { %4415 = vmatpush3.bf16.msra.mxu0 %v4412_v14  ;;  %v667_v60 = vld [vmem:[#allocation2 + $0x9] sm:$0xff]  ;;  %v3695_v7 = vld [vmem:[%s5308_s1 + $0x140] sm:$0xff]  ;;  %v3698_v11 = vld [vmem:[%s5308_s1 + $0x158] sm:$0xff] }
  0x3b   : > { %4417 = vmatprep.subr.bf16.mxu0 %v4416_v18  ;;  %v3687_v61 = vld [vmem:[%s5308_s1 + $0x110] sm:$0xff]  ;;  %v3690_v2 = vld [vmem:[%s5308_s1 + $0x128] sm:$0xff]  ;;  %v3699_v15 = vld [vmem:[%s5308_s1 + $0x160] sm:$0xff] }
  0x3c   : > { %v4468_v63 = vpack.c.bf16 %v3688_v62, %v3687_v61  ;;  %v4472_v3 = vpack.c.bf16 %v3690_v2, %v3689_v1  ;;  %v3691_v4 = vld [vmem:[%s5308_s1 + $0x130] sm:$0xff]  ;;  %v3696_v8 = vld [vmem:[%s5308_s1 + $0x148] sm:$0xff]  ;;  %v3702_v19 = vld [vmem:[%s5308_s1 + $0x178] sm:$0xff] }
  0x3d   : > { %v4476_v6 = vpack.c.bf16 %v3692_v5, %v3691_v4  ;;  %v4480_v9 = vpack.c.bf16 %v3696_v8, %v3695_v7  ;;  %v3697_v10 = vld [vmem:[%s5308_s1 + $0x150] sm:$0xff]  ;;  %v3700_v16 = vld [vmem:[%s5308_s1 + $0x168] sm:$0xff]  ;;  %v920_v36 = vld [vmem:[#allocation5] sm:$0xff] }
  0x3e   : > { %4419 = vmatpush3.bf16.msra.mxu0 %v4416_v18  ;;  %v668_v12 = vld [vmem:[#allocation2 + $0x11] sm:$0xff]  ;;  %v4484_v13 = vpack.c.bf16 %v3698_v11, %v3697_v10  ;;  %v4488_v17 = vpack.c.bf16 %v3700_v16, %v3699_v15  ;;  %v3704_v22 = vld [vmem:[%s5308_s1 + $0x188] sm:$0xff]  ;;  %v1096_v48 = vld [vmem:[#allocation5 + $0x40] sm:$0xff] }
  0x3f   : > { %4421 = vmatprep.subr.bf16.mxu0 %v4420_v21  ;;  %v763_v14 = vld [vmem:[#allocation2 + $0xa] sm:$0xff]  ;;  %v3708_v1 = vld [vmem:[%s5311_s4] ss:$0 sm:$0xff] }
  0x40   : > { %v3701_v18 = vld [vmem:[%s5308_s1 + $0x170] sm:$0xff]  ;;  %v921_v37 = vld [vmem:[#allocation5 + $0x8] sm:$0xff]  ;;  %v3709_v4 = vld [vmem:[%s5312_s5] ss:$0 sm:$0xff] }
  0x41   : > { %4020 = vmatmul.mubr.msk.f32.vlgmr.msra.gmra.mrb[0].mxu0 %vm378_vm1, %v397_v24  ;;  %v4492_v20 = vpack.c.bf16 %v3702_v19, %v3701_v18  ;;  %v764_v24 = vld [vmem:[#allocation2 + $0x12] sm:$0xff]  ;;  %v4508_v39 = vpack.c.bf16 %v921_v37, %v920_v36  ;;  %v928_v40 = vld [vmem:[#allocation5 + $0x28] sm:$0xff] }
  0x42   : > { %4423 = vmatpush3.bf16.msra.mxu0 %v4420_v21  ;;  %4042 = vmatprep.mubr.msk.f32.mxu0 %vm378_vm1, %v384_v26  ;;  %v3703_v21 = vld [vmem:[%s5308_s1 + $0x180] sm:$0xff]  ;;  %v929_v44 = vld [vmem:[#allocation5 + $0x30] sm:$0xff]  ;;  %v1097_v0 = vld [vmem:[#allocation5 + $0x48] sm:$0xff] }
  0x43   : > { %4425 = vmatprep.subr.bf16.mxu0 %v4424_v25  ;;  %v4496_v23 = vpack.c.bf16 %v3704_v22, %v3703_v21  ;;  %4509 = vmatprep.subr.bf16.mxu1 %v4508_v39  ;;  %v1186_v22 = vld [vmem:[#allocation5 + $0x60] sm:$0xff]  ;;  %v1278_v36 = vld [vmem:[#allocation5 + $0x90] sm:$0xff]  ;;  %v1279_v37 = vld [vmem:[#allocation5 + $0x98] sm:$0xff] }
  0x44   : > { %4511 = vmatpush3.bf16.msra.mxu1 %v4508_v39 }
  0x46   : > { %4427 = vmatpush3.bf16.msra.mxu0 %v4424_v25  ;;  %v3707_v25 = vld [vmem:[%s5310_s3] ss:$0 sm:$0xff] }
  0x47   : > { %4429 = vmatprep.subr.bf16.mxu0 %v4428_v29 }
  0x4a   : > { %4431 = vmatpush3.bf16.msra.mxu0 %v4428_v29 }
  0x4b   : > { %4433 = vmatprep.subr.bf16.mxu0 %v4432_v32 }
  0x4e   : > { %4435 = vmatpush3.bf16.msra.mxu0 %v4432_v32 }
  0x4f   : > { %4437 = vmatprep.subr.bf16.mxu0 %v4436_v35 }
  0x52   : > { %4439 = vmatpush3.bf16.msra.mxu0 %v4436_v35 }
  0x53   : > { %4441 = vmatprep.subr.bf16.mxu0 %v4440_v38 }
  0x55   : > { %4043 = vmatmul.mubr.msk.f32.vlgmr.msra.gmra.mrb[0].mxu0 %vm378_vm1, %v385_v41 }
  0x56   : > { %4443 = vmatpush3.bf16.msra.mxu0 %v4440_v38  ;;  %4065 = vmatprep.mubr.msk.f32.mxu0 %vm378_vm1, %v571_v43  ;;  %v927_v38 = vld [vmem:[#allocation5 + $0x20] sm:$0xff]  ;;  %v923_v43 = vld [vmem:[#allocation5 + $0x18] sm:$0xff] }
  0x57   : > { %4445 = vmatprep.subr.bf16.mxu0 %v4444_v42  ;;  %v4500_v41 = vpack.c.bf16 %v928_v40, %v927_v38  ;;  %v4536_v38 = vpack.c.bf16 %v1279_v37, %v1278_v36  ;;  %v1599_v37 = vld [vmem:[#allocation5 + $0xe0] sm:$0xff] }
  0x5a   : > { %4447 = vmatpush3.bf16.msra.mxu0 %v4444_v42  ;;  %v922_v42 = vld [vmem:[#allocation5 + $0x10] sm:$0xff] }
  0x5b   : > { %4449 = vmatprep.subr.bf16.mxu0 %v4448_v46  ;;  %v4512_v45 = vpack.c.bf16 %v923_v43, %v922_v42 }
  0x5d   : > { %4513 = vmatprep.subr.bf16.mxu1 %v4512_v45 }
  0x5e   : > { %4451 = vmatpush3.bf16.msra.mxu0 %v4448_v46  ;;  %v930_v46 = vld [vmem:[#allocation5 + $0x38] sm:$0xff]  ;;  %4515 = vmatpush3.bf16.msra.mxu1 %v4512_v45 }
  0x5f   : > { %4453 = vmatprep.subr.bf16.mxu0 %v4452_v49  ;;  %v4504_v47 = vpack.c.bf16 %v930_v46, %v929_v44  ;;  %v3720_v44 = vld [vmem:[%s5310_s3 + $0x1] ss:$0 sm:$0xff] }
  0x62   : > { %4455 = vmatpush3.bf16.msra.mxu0 %v4452_v49  ;;  %v4516_v49 = vpack.c.bf16 %v1097_v0, %v1096_v48 }
  0x63   : > { %4457 = vmatprep.subr.bf16.mxu0 %v4456_v52 }
  0x64   : > { %4517 = vmatprep.subr.bf16.mxu1 %v4516_v49 }
  0x66   : > { %4459 = vmatpush3.bf16.msra.mxu0 %v4456_v52 }
  0x67   : > { %4461 = vmatprep.subr.bf16.mxu0 %v4460_v55 }
  0x69   : > { %4066 = vmatmul.mubr.msk.f32.vlgmr.msra.gmra.mrb[0].mxu0 %vm378_vm1, %v572_v58 }
  0x6a   : > { %4463 = vmatpush3.bf16.msra.mxu0 %v4460_v55  ;;  %4088 = vmatprep.mubr.msk.f32.mxu0 %vm378_vm1, %v667_v60 }
  0x6b   : > { %4465 = vmatprep.subr.bf16.mxu0 %v4464_v59 }
  0x6e   : > { %4467 = vmatpush3.bf16.msra.mxu0 %v4464_v59 }
  0x6f   : > { %4469 = vmatprep.subr.bf16.mxu0 %v4468_v63 }
  0x72   : > { %4471 = vmatpush3.bf16.msra.mxu0 %v4468_v63 }
  0x73   : > { %4473 = vmatprep.subr.bf16.mxu0 %v4472_v3 }
  0x76   : > { %4475 = vmatpush3.bf16.msra.mxu0 %v4472_v3 }
  0x77   : > { %4477 = vmatprep.subr.bf16.mxu0 %v4476_v6 }
  0x7a   : > { %4479 = vmatpush3.bf16.msra.mxu0 %v4476_v6 }
  0x7b   : > { %4481 = vmatprep.subr.bf16.mxu0 %v4480_v9 }
  0x7d   : > { %4089 = vmatmul.mubr.msk.f32.vlgmr.msra.gmra.mrb[0].mxu0 %vm378_vm1, %v668_v12 }
  0x7e   : > { %4483 = vmatpush3.bf16.msra.mxu0 %v4480_v9  ;;  %4111 = vmatprep.mubr.msk.f32.mxu0 %vm378_vm1, %v763_v14 }
  0x7f   : > { %4485 = vmatprep.subr.bf16.mxu0 %v4484_v13 }
  0x82   : > { %4487 = vmatpush3.bf16.msra.mxu0 %v4484_v13 }
  0x83   : > { %4489 = vmatprep.subr.bf16.mxu0 %v4488_v17 }
  0x86   : > { %4491 = vmatpush3.bf16.msra.mxu0 %v4488_v17  ;;  %v1098_v17 = vld [vmem:[#allocation5 + $0x50] sm:$0xff] }
  0x87   : > { %4493 = vmatprep.subr.bf16.mxu0 %v4492_v20 }
  0x8a   : > { %4495 = vmatpush3.bf16.msra.mxu0 %v4492_v20  ;;  %v1099_v20 = vld [vmem:[#allocation5 + $0x58] sm:$0xff] }
  0x8b   : > { %4497 = vmatprep.subr.bf16.mxu0 %v4496_v23  ;;  %v4520_v21 = vpack.c.bf16 %v1099_v20, %v1098_v17  ;;  %v3722_v20 = vld [vmem:[%s5312_s5 + $0x1] ss:$0 sm:$0xff] }
  0x8e   : > { %4499 = vmatpush3.bf16.msra.mxu0 %v4496_v23 }
  0x8f   : > { %4501 = vmatprep.subr.bf16.mxu0 %v4500_v41 }
  0x91   : > { %4112 = vmatmul.mubr.msk.f32.vlgmr.msra.gmra.mrb[0].mxu0 %vm378_vm1, %v764_v24 }
  0x92   : > { %4503 = vmatpush3.bf16.msra.mxu0 %v4500_v41 }
  0x93   : > { %4505 = vmatprep.subr.bf16.mxu0 %v4504_v47 }
  0x96   : > { %4507 = vmatpush3.bf16.msra.mxu0 %v4504_v47 }
 0x164   : > { %v4113_v26 = vpop.f32.mrb[0].mxu0 }
 0x165   : > { %v848_v27 = vpop.f32.mrb[1].mxu0  ;;  %v5126_v28 = vadd.f32 %v4113_v26, %v3707_v25 }
 0x166   : > { %v863_v29 = vadd.f32 %v3707_v25, %v848_v27  ;;  %v1187_v25 = vld [vmem:[#allocation5 + $0x68] sm:$0xff] }
 0x167   : > { %v876_v33 = vmul.f32 %v5126_v28, %v5126_v28  ;;  %v869_v34 = vsel %vm865_vm2, %v5126_v28, 0.0  ;;  %v4524_v27 = vpack.c.bf16 %v1187_v25, %v1186_v22 }
 0x168   : > { %v866_v30 = vsel %vm865_vm2, %v863_v29, 0.0  ;;  %v875_v31 = vmul.f32 %v863_v29, %v863_v29 }
 0x169   : > { %867 = vadd.xlane.f32.xlu0 %v866_v30  ;;  %v880_v35 = vsel %vm865_vm2, %v876_v33, 0.0  ;;  %v1277_v33 = vld [vmem:[#allocation5 + $0x88] sm:$0xff] }
 0x16a   : > { %v877_v32 = vsel %vm865_vm2, %v875_v31, 0.0 }
 0x16b   : > { %878 = vadd.xlane.f32.xlu1 %v877_v32  ;;  %v1276_v32 = vld [vmem:[#allocation5 + $0x80] sm:$0xff] }
 0x16d   : > { %870 = vadd.xlane.f32.xlu0 %v869_v34 }
 0x16f   : > { %881 = vadd.xlane.f32.xlu1 %v880_v35  ;;  %v4532_v35 = vpack.c.bf16 %v1277_v33, %v1276_v32  ;;  %v1425_v32 = vld [vmem:[#allocation5 + $0xb0] sm:$0xff]  ;;  %v1426_v33 = vld [vmem:[#allocation5 + $0xb8] sm:$0xff] }
 0x170   : > { %v4552_v36 = vpack.c.bf16 %v1426_v33, %v1425_v32  ;;  %v3734_v33 = vld [vmem:[%s5311_s4 + $0x2] ss:$0 sm:$0xff] }
 0x1f6   : > { %v868_v50 = vpop.xlane.xlu0 %867 }
 0x1f7   : > { %v873_v51 = vmul.f32 0.03125, %v868_v50 }
 0x1f8   : > { %v879_v52 = vpop.xlane.xlu1 %878 }
 0x1f9   : > { %v885_v53 = vmul.f32 %v873_v51, %v873_v51  ;;  %v883_v54 = vmul.f32 0.03125, %v879_v52 }
 0x1fa   : > { %v871_v55 = vpop.xlane.xlu0 %870 }
 0x1fb   : > { %v887_v56 = vsub.f32 %v883_v54, %v885_v53  ;;  %v874_v57 = vmul.f32 0.03125, %v871_v55 }
 0x1fc   : > { %v882_v58 = vpop.xlane.xlu1 %881 }
 0x1fd   : > { %v889_v59 = vadd.f32 1e-05, %v887_v56  ;;  %v886_v60 = vmul.f32 %v874_v57, %v874_v57  ;;  %v884_v61 = vmul.f32 0.03125, %v882_v58  ;;  %v1430_v56 = vld [vmem:[#allocation5 + $0xc0] sm:$0xff]  ;;  %v1432_v58 = vld [vmem:[#allocation5 + $0xd0] sm:$0xff] }
 0x1ff   : > { %4781 = vrsqrt.f32 %v889_v59  ;;  %v888_v62 = vsub.f32 %v884_v61, %v886_v60  ;;  %v1433_v60 = vld [vmem:[#allocation5 + $0xd8] sm:$0xff] }
 0x200   : > { %v4544_v61 = vpack.c.bf16 %v1433_v60, %v1432_v58 }
 0x201   : > { %v890_v63 = vadd.f32 1e-05, %v888_v62  ;;  %v1423_v62 = vld [vmem:[#allocation5 + $0xa0] sm:$0xff] }
 0x203   : > { %4783 = vrsqrt.f32 %v890_v63  ;;  %v1424_v63 = vld [vmem:[#allocation5 + $0xa8] sm:$0xff] }
 0x209   : > { %v4782_v2 = vpop.eup %4781 }
 0x20a   : > { %v897_v3 = vmul.f32 %v4782_v2, %v3708_v1 }
 0x20c   : > { %v901_v5 = vmul.f32 %v897_v3, %v873_v51  ;;  %v899_v7 = vmul.f32 %v897_v3, %v863_v29  ;;  %v1189_v29 = vld [vmem:[#allocation5 + $0x78] sm:$0xff] }
 0x20d   : > { %v4784_v6 = vpop.eup %4783 }
 0x20e   : > { %v907_v8 = vsub.f32 %v3709_v4, %v901_v5  ;;  %v898_v9 = vmul.f32 %v4784_v6, %v3708_v1  ;;  %v4548_v1 = vpack.c.bf16 %v1424_v63, %v1423_v62  ;;  %v3733_v62 = vld [vmem:[%s5310_s3 + $0x2] ss:$0 sm:$0xff] }
 0x210   : > { %v909_v10 = vadd.f32 %v907_v8, %v899_v7  ;;  %v902_v11 = vmul.f32 %v898_v9, %v874_v57  ;;  %v900_v13 = vmul.f32 %v898_v9, %v5126_v28  ;;  %v1188_v28 = vld [vmem:[#allocation5 + $0x70] sm:$0xff]  ;;  %v1431_v57 = vld [vmem:[#allocation5 + $0xc8] sm:$0xff] }
 0x211   : > { %v4528_v30 = vpack.c.bf16 %v1189_v29, %v1188_v28  ;;  %v4540_v59 = vpack.c.bf16 %v1431_v57, %v1430_v56  ;;  %v1781_v56 = vld [vmem:[#allocation5 + $0x130] sm:$0xff]  ;;  %v1782_v57 = vld [vmem:[#allocation5 + $0x138] sm:$0xff] }
 0x212   : > { %v911_v12 = vmax.f32 %v909_v10, 0.0  ;;  %v908_v14 = vsub.f32 %v3709_v4, %v902_v11  ;;  %v4576_v58 = vpack.c.bf16 %v1782_v57, %v1781_v56  ;;  %v2104_v57 = vld [vmem:[#allocation5 + $0x190] sm:$0xff] }
 0x214   : > { %913 = vst.msk [vmem:[#allocation3 + $0x8] sm:$0xff] %vm865_vm2, %v911_v12  ;;  %v910_v15 = vadd.f32 %v908_v14, %v900_v13 }
 0x216   : > { %v912_v16 = vmax.f32 %v910_v15, 0.0 }
 0x218   : > { %914 = vst.msk [vmem:[#allocation3 + $0x10] sm:$0xff] %vm865_vm2, %v912_v16  ;;  %v3721_v16 = vld [vmem:[%s5311_s4 + $0x1] ss:$0 sm:$0xff] }
 0x21b   : > { %v924_v18 = vld [vmem:[#allocation3 + $0x7] sm:$0xff] }
 0x21c   : > { %v918_v19 = vld [vmem:[#allocation3 + $0x6] sm:$0xff]  ;;  %4122 = vmatprep.mubr.msk.f32.mxu0 %vm865_vm2, %v924_v18 }
 0x21d   : > { %4133 = vmatprep.mubr.msk.f32.mxu1 %vm865_vm2, %v918_v19  ;;  %v1093_v26 = vld [vmem:[#allocation3 + $0x8] sm:$0xff] }
 0x21f   : > { %v925_v23 = vld [vmem:[#allocation3 + $0xf] sm:$0xff] }
 0x220   : > { %v919_v24 = vld [vmem:[#allocation3 + $0xe] sm:$0xff]  ;;  %4123 = vmatmul.mubr.msk.f32.vlgmr.msra.gmra.mrb[2].mxu0 %vm865_vm2, %v925_v23 }
 0x221   : > { %4134 = vmatmul.mubr.msk.f32.vlgmr.msra.gmra.mrb[0].mxu1 %vm865_vm2, %v919_v24  ;;  %v1094_v31 = vld [vmem:[#allocation3 + $0x10] sm:$0xff] }
 0x222   : > { %4519 = vmatpush3.bf16.msra.mxu1 %v4516_v49  ;;  %4144 = vmatprep.mubr.msk.f32.mxu1 %vm865_vm2, %v1093_v26  ;;  %v1183_v34 = vld [vmem:[#allocation3 + $0x9] sm:$0xff]  ;;  %v1184_v39 = vld [vmem:[#allocation3 + $0x11] sm:$0xff] }
 0x223   : > { %4521 = vmatprep.subr.bf16.mxu1 %v4520_v21  ;;  %v1273_v40 = vld [vmem:[#allocation3 + $0xa] sm:$0xff]  ;;  %v1274_v41 = vld [vmem:[#allocation3 + $0x12] sm:$0xff] }
 0x226   : > { %4523 = vmatpush3.bf16.msra.mxu1 %v4520_v21 }
 0x227   : > { %4525 = vmatprep.subr.bf16.mxu1 %v4524_v27 }
 0x229   : > { %4145 = vmatmul.mubr.msk.f32.vlgmr.msra.gmra.mrb[0].mxu1 %vm865_vm2, %v1094_v31 }
 0x22a   : > { %4527 = vmatpush3.bf16.msra.mxu1 %v4524_v27  ;;  %4155 = vmatprep.mubr.msk.f32.mxu1 %vm865_vm2, %v1183_v34 }
 0x22b   : > { %4529 = vmatprep.subr.bf16.mxu1 %v4528_v30 }
 0x22e   : > { %4531 = vmatpush3.bf16.msra.mxu1 %v4528_v30 }
 0x22f   : > { %4533 = vmatprep.subr.bf16.mxu1 %v4532_v35 }
 0x231   : > { %4156 = vmatmul.mubr.msk.f32.vlgmr.msra.gmra.mrb[0].mxu1 %vm865_vm2, %v1184_v39 }
 0x232   : > { %4535 = vmatpush3.bf16.msra.mxu1 %v4532_v35  ;;  %4166 = vmatprep.mubr.msk.f32.mxu1 %vm865_vm2, %v1273_v40 }
 0x233   : > { %4537 = vmatprep.subr.bf16.mxu1 %v4536_v38 }
 0x236   : > { %4539 = vmatpush3.bf16.msra.mxu1 %v4536_v38  ;;  %v1600_v38 = vld [vmem:[#allocation5 + $0xe8] sm:$0xff] }
 0x237   : > { %4541 = vmatprep.subr.bf16.mxu1 %v4540_v59  ;;  %v4556_v40 = vpack.c.bf16 %v1600_v38, %v1599_v37  ;;  %v3735_v37 = vld [vmem:[%s5312_s5 + $0x2] ss:$0 sm:$0xff] }
 0x239   : > { %4167 = vmatmul.mubr.msk.f32.vlgmr.msra.gmra.mrb[0].mxu1 %vm865_vm2, %v1274_v41  ;;  %v1601_v41 = vld [vmem:[#allocation5 + $0xf0] sm:$0xff] }
 0x23a   : > { %4543 = vmatpush3.bf16.msra.mxu1 %v4540_v59 }
 0x23b   : > { %4545 = vmatprep.subr.bf16.mxu1 %v4544_v61 }
 0x23e   : > { %4547 = vmatpush3.bf16.msra.mxu1 %v4544_v61 }
 0x23f   : > { %4549 = vmatprep.subr.bf16.mxu1 %v4548_v1 }
 0x2f3   : > { %v4124_v42 = vpop.f32.mrb[2].mxu0 }
 0x2f4   : > { %v1003_v43 = vpop.f32.mrb[3].mxu0 }
 0x30c   : > { %v4168_v45 = vpop.f32.mrb[0].mxu1 }
 0x30d   : > { %v4708_v46 = vadd.f32 %v4168_v45, %v4124_v42  ;;  %v1352_v47 = vpop.f32.mrb[1].mxu1  ;;  %v1602_v42 = vld [vmem:[#allocation5 + $0xf8] sm:$0xff]  ;;  %v1689_v45 = vld [vmem:[#allocation5 + $0x100] sm:$0xff] }
 0x30e   : > { %v4709_v48 = vadd.f32 %v1352_v47, %v1003_v43  ;;  %v4560_v43 = vpack.c.bf16 %v1602_v42, %v1601_v41 }
 0x30f   : > { %v1368_v0 = vadd.f32 %v4708_v46, %v3720_v44  ;;  %v1690_v46 = vld [vmem:[#allocation5 + $0x108] sm:$0xff] }
 0x310   : > { %v1367_v49 = vadd.f32 %v4709_v48, %v3720_v44  ;;  %v4564_v48 = vpack.c.bf16 %v1690_v46, %v1689_v45 }
 0x311   : > { %v1372_v50 = vsel %vm865_vm2, %v1368_v0, 0.0  ;;  %v1378_v51 = vmul.f32 %v1368_v0, %v1368_v0 }
 0x312   : > { %1373 = vadd.xlane.f32.xlu1 %v1372_v50  ;;  %v1369_v52 = vsel %vm865_vm2, %v1367_v49, 0.0  ;;  %v1377_v53 = vmul.f32 %v1367_v49, %v1367_v49 }
 0x313   : > { %1370 = vadd.xlane.f32.xlu0 %v1369_v52  ;;  %v1382_v54 = vsel %vm865_vm2, %v1378_v51, 0.0  ;;  %v1779_v52 = vld [vmem:[#allocation5 + $0x120] sm:$0xff] }
 0x314   : > { %v1379_v55 = vsel %vm865_vm2, %v1377_v53, 0.0  ;;  %v1780_v53 = vld [vmem:[#allocation5 + $0x128] sm:$0xff] }
 0x316   : > { %1383 = vadd.xlane.f32.xlu1 %v1382_v54 }
 0x317   : > { %1380 = vadd.xlane.f32.xlu0 %v1379_v55  ;;  %v4572_v55 = vpack.c.bf16 %v1780_v53, %v1779_v52  ;;  %v2102_v53 = vld [vmem:[#allocation5 + $0x180] sm:$0xff] }
 0x39f   : > { %v1374_v2 = vpop.xlane.xlu1 %1373 }
 0x3a0   : > { %v1376_v3 = vmul.f32 0.03125, %v1374_v2  ;;  %v1371_v4 = vpop.xlane.xlu0 %1370 }
 0x3a1   : > { %v1375_v5 = vmul.f32 0.03125, %v1371_v4 }
 0x3a2   : > { %v1388_v7 = vmul.f32 %v1376_v3, %v1376_v3 }
 0x3a3   : > { %v1384_v6 = vpop.xlane.xlu1 %1383  ;;  %v1387_v10 = vmul.f32 %v1375_v5, %v1375_v5 }
 0x3a4   : > { %v1386_v8 = vmul.f32 0.03125, %v1384_v6  ;;  %v1381_v9 = vpop.xlane.xlu0 %1380 }
 0x3a5   : > { %v1385_v11 = vmul.f32 0.03125, %v1381_v9 }
 0x3a6   : > { %v1390_v12 = vsub.f32 %v1386_v8, %v1388_v7 }
 0x3a7   : > { %v1389_v13 = vsub.f32 %v1385_v11, %v1387_v10  ;;  %v1933_v10 = vld [vmem:[#allocation5 + $0x160] sm:$0xff]  ;;  %v1934_v11 = vld [vmem:[#allocation5 + $0x168] sm:$0xff] }
 0x3a8   : > { %v1392_v14 = vadd.f32 1e-05, %v1390_v12  ;;  %v1935_v12 = vld [vmem:[#allocation5 + $0x170] sm:$0xff] }
 0x3a9   : > { %v1391_v15 = vadd.f32 1e-05, %v1389_v13  ;;  %v4580_v13 = vpack.c.bf16 %v1934_v11, %v1933_v10  ;;  %v2284_v10 = vld [vmem:[#allocation5 + $0x1d0] sm:$0xff]  ;;  %v2285_v11 = vld [vmem:[#allocation5 + $0x1d8] sm:$0xff] }
 0x3aa   : > { %4785 = vrsqrt.f32 %v1392_v14  ;;  %v1936_v14 = vld [vmem:[#allocation5 + $0x178] sm:$0xff] }
 0x3ab   : > { %4787 = vrsqrt.f32 %v1391_v15  ;;  %v4584_v15 = vpack.c.bf16 %v1936_v14, %v1935_v12  ;;  %v4616_v12 = vpack.c.bf16 %v2285_v11, %v2284_v10  ;;  %v2607_v11 = vld [vmem:[#allocation5 + $0x230] sm:$0xff] }
 0x3b4   : > { %v4786_v17 = vpop.eup %4785 }
 0x3b5   : > { %v4788_v18 = vpop.eup %4787  ;;  %v1400_v19 = vmul.f32 %v4786_v17, %v3721_v16  ;;  %v1927_v17 = vld [vmem:[#allocation5 + $0x148] sm:$0xff] }
 0x3b6   : > { %v1399_v21 = vmul.f32 %v4788_v18, %v3721_v16  ;;  %v1926_v16 = vld [vmem:[#allocation5 + $0x140] sm:$0xff] }
 0x3b7   : > { %v1404_v22 = vmul.f32 %v1400_v19, %v1376_v3  ;;  %v1402_v24 = vmul.f32 %v1400_v19, %v1368_v0  ;;  %v1691_v0 = vld [vmem:[#allocation5 + $0x110] sm:$0xff]  ;;  %v4588_v18 = vpack.c.bf16 %v1927_v17, %v1926_v16  ;;  %v3746_v16 = vld [vmem:[%s5310_s3 + $0x3] ss:$0 sm:$0xff] }
 0x3b8   : > { %v1403_v23 = vmul.f32 %v1399_v21, %v1375_v5  ;;  %v1401_v26 = vmul.f32 %v1399_v21, %v1367_v49  ;;  %v1692_v49 = vld [vmem:[#allocation5 + $0x118] sm:$0xff] }
 0x3b9   : > { %v1410_v25 = vsub.f32 %v3722_v20, %v1404_v22  ;;  %v4568_v50 = vpack.c.bf16 %v1692_v49, %v1691_v0  ;;  %v1928_v0 = vld [vmem:[#allocation5 + $0x150] sm:$0xff]  ;;  %v1929_v49 = vld [vmem:[#allocation5 + $0x158] sm:$0xff] }
 0x3ba   : > { %v1409_v27 = vsub.f32 %v3722_v20, %v1403_v23  ;;  %v4592_v52 = vpack.c.bf16 %v1929_v49, %v1928_v0  ;;  %v3747_v49 = vld [vmem:[%s5311_s4 + $0x3] ss:$0 sm:$0xff] }
 0x3bb   : > { %v1412_v28 = vadd.f32 %v1410_v25, %v1402_v24 }
 0x3bc   : > { %v1411_v29 = vadd.f32 %v1409_v27, %v1401_v26 }
 0x3bd   : > { %v1414_v30 = vmax.f32 %v1412_v28, 0.0 }
 0x3be   : > { %v1413_v31 = vmax.f32 %v1411_v29, 0.0 }
 0x3bf   : > { %1416 = vst.msk [vmem:[#allocation4 + $0x10] sm:$0xff] %vm865_vm2, %v1414_v30 }
 0x3c0   : > { %1415 = vst.msk [vmem:[#allocation4 + $0x8] sm:$0xff] %vm865_vm2, %v1413_v31 }
 0x3c6   : > { %v1597_v51 = vld [vmem:[#allocation4 + $0x10] sm:$0xff] }
 0x3c7   : > { %v1427_v34 = vld [vmem:[#allocation4 + $0x7] sm:$0xff]  ;;  %v1428_v35 = vld [vmem:[#allocation4 + $0xf] sm:$0xff] }
 0x3c8   : > { %4177 = vmatprep.mubr.msk.f32.mxu1 %vm865_vm2, %v1427_v34  ;;  %v1420_v39 = vld [vmem:[#allocation4 + $0x6] sm:$0xff]  ;;  %v1421_v44 = vld [vmem:[#allocation4 + $0xe] sm:$0xff] }
 0x3c9   : > { %4178 = vmatmul.mubr.msk.f32.vlgmr.msra.gmra.mrb[2].mxu1 %vm865_vm2, %v1428_v35  ;;  %v1596_v47 = vld [vmem:[#allocation4 + $0x8] sm:$0xff]  ;;  %v1687_v59 = vld [vmem:[#allocation4 + $0x11] sm:$0xff] }
 0x3ca   : > { %4551 = vmatpush3.bf16.msra.mxu1 %v4548_v1  ;;  %4188 = vmatprep.mubr.msk.f32.mxu1 %vm865_vm2, %v1420_v39  ;;  %v1686_v54 = vld [vmem:[#allocation4 + $0x9] sm:$0xff]  ;;  %v1777_v61 = vld [vmem:[#allocation4 + $0x12] sm:$0xff] }
 0x3cb   : > { %4553 = vmatprep.subr.bf16.mxu1 %v4552_v36  ;;  %v1776_v60 = vld [vmem:[#allocation4 + $0xa] sm:$0xff] }
 0x3ce   : > { %4555 = vmatpush3.bf16.msra.mxu1 %v4552_v36 }
 0x3cf   : > { %4557 = vmatprep.subr.bf16.mxu1 %v4556_v40 }
 0x3d1   : > { %4189 = vmatmul.mubr.msk.f32.vlgmr.msra.gmra.mrb[2].mxu1 %vm865_vm2, %v1421_v44 }
 0x3d2   : > { %4559 = vmatpush3.bf16.msra.mxu1 %v4556_v40  ;;  %4199 = vmatprep.mubr.msk.f32.mxu1 %vm865_vm2, %v1596_v47 }
 0x3d3   : > { %4561 = vmatprep.subr.bf16.mxu1 %v4560_v43 }
 0x3d6   : > { %4563 = vmatpush3.bf16.msra.mxu1 %v4560_v43 }
 0x3d7   : > { %4565 = vmatprep.subr.bf16.mxu1 %v4564_v48 }
 0x3d9   : > { %4200 = vmatmul.mubr.msk.f32.vlgmr.msra.gmra.mrb[2].mxu1 %vm865_vm2, %v1597_v51 }
 0x3da   : > { %4567 = vmatpush3.bf16.msra.mxu1 %v4564_v48  ;;  %4210 = vmatprep.mubr.msk.f32.mxu1 %vm865_vm2, %v1686_v54  ;;  %v2103_v54 = vld [vmem:[#allocation5 + $0x188] sm:$0xff] }
 0x3db   : > { %4569 = vmatprep.subr.bf16.mxu1 %v4568_v50  ;;  %v4596_v56 = vpack.c.bf16 %v2103_v54, %v2102_v53  ;;  %v3748_v53 = vld [vmem:[%s5312_s5 + $0x3] ss:$0 sm:$0xff] }
 0x3de   : > { %4571 = vmatpush3.bf16.msra.mxu1 %v4568_v50 }
 0x3df   : > { %4573 = vmatprep.subr.bf16.mxu1 %v4572_v55 }
 0x3e1   : > { %4211 = vmatmul.mubr.msk.f32.vlgmr.msra.gmra.mrb[2].mxu1 %vm865_vm2, %v1687_v59 }
 0x3e2   : > { %4575 = vmatpush3.bf16.msra.mxu1 %v4572_v55  ;;  %4221 = vmatprep.mubr.msk.f32.mxu1 %vm865_vm2, %v1776_v60 }
 0x3e3   : > { %4577 = vmatprep.subr.bf16.mxu1 %v4576_v58 }
 0x3e6   : > { %4579 = vmatpush3.bf16.msra.mxu1 %v4576_v58  ;;  %v2105_v58 = vld [vmem:[#allocation5 + $0x198] sm:$0xff] }
 0x3e7   : > { %4581 = vmatprep.subr.bf16.mxu1 %v4580_v13  ;;  %v4600_v59 = vpack.c.bf16 %v2105_v58, %v2104_v57 }
 0x3e9   : > { %4222 = vmatmul.mubr.msk.f32.vlgmr.msra.gmra.mrb[2].mxu1 %vm865_vm2, %v1777_v61  ;;  %v2192_v61 = vld [vmem:[#allocation5 + $0x1a0] sm:$0xff] }
 0x3ea   : > { %4583 = vmatpush3.bf16.msra.mxu1 %v4580_v13 }
 0x3eb   : > { %4585 = vmatprep.subr.bf16.mxu1 %v4584_v15 }
 0x3ee   : > { %4587 = vmatpush3.bf16.msra.mxu1 %v4584_v15 }
 0x3ef   : > { %4589 = vmatprep.subr.bf16.mxu1 %v4588_v18 }
 0x4bc   : > { %v4223_v63 = vpop.f32.mrb[2].mxu1 }
 0x4bd   : > { %v1871_v1 = vadd.f32 %v4223_v63, %v3733_v62  ;;  %v1855_v2 = vpop.f32.mrb[3].mxu1 }
 0x4be   : > { %v1870_v3 = vadd.f32 %v3733_v62, %v1855_v2  ;;  %v2193_v62 = vld [vmem:[#allocation5 + $0x1a8] sm:$0xff]  ;;  %v2194_v2 = vld [vmem:[#allocation5 + $0x1b0] sm:$0xff] }
 0x4bf   : > { %v1875_v4 = vsel %vm865_vm2, %v1871_v1, 0.0  ;;  %v1881_v5 = vmul.f32 %v1871_v1, %v1871_v1 }
 0x4c0   : > { %1876 = vadd.xlane.f32.xlu1 %v1875_v4  ;;  %v1872_v6 = vsel %vm865_vm2, %v1870_v3, 0.0  ;;  %v1880_v7 = vmul.f32 %v1870_v3, %v1870_v3 }
 0x4c1   : > { %1873 = vadd.xlane.f32.xlu0 %v1872_v6  ;;  %v1885_v8 = vsel %vm865_vm2, %v1881_v5, 0.0  ;;  %v2282_v6 = vld [vmem:[#allocation5 + $0x1c0] sm:$0xff] }
 0x4c2   : > { %v1882_v9 = vsel %vm865_vm2, %v1880_v7, 0.0  ;;  %v2283_v7 = vld [vmem:[#allocation5 + $0x1c8] sm:$0xff] }
 0x4c4   : > { %1886 = vadd.xlane.f32.xlu1 %v1885_v8 }
 0x4c5   : > { %1883 = vadd.xlane.f32.xlu0 %v1882_v9  ;;  %v4612_v9 = vpack.c.bf16 %v2283_v7, %v2282_v6  ;;  %v2605_v7 = vld [vmem:[#allocation5 + $0x220] sm:$0xff] }
 0x54d   : > { %v1877_v19 = vpop.xlane.xlu1 %1876 }
 0x54e   : > { %v1879_v20 = vmul.f32 0.03125, %v1877_v19  ;;  %v1874_v21 = vpop.xlane.xlu0 %1873 }
 0x54f   : > { %v1878_v22 = vmul.f32 0.03125, %v1874_v21 }
 0x550   : > { %v1891_v24 = vmul.f32 %v1879_v20, %v1879_v20 }
 0x551   : > { %v1887_v23 = vpop.xlane.xlu1 %1886  ;;  %v1890_v27 = vmul.f32 %v1878_v22, %v1878_v22 }
 0x552   : > { %v1889_v25 = vmul.f32 0.03125, %v1887_v23  ;;  %v1884_v26 = vpop.xlane.xlu0 %1883 }
 0x553   : > { %v1888_v28 = vmul.f32 0.03125, %v1884_v26 }
 0x554   : > { %v1893_v29 = vsub.f32 %v1889_v25, %v1891_v24 }
 0x555   : > { %v1892_v30 = vsub.f32 %v1888_v28, %v1890_v27  ;;  %v2436_v27 = vld [vmem:[#allocation5 + $0x200] sm:$0xff]  ;;  %v2437_v28 = vld [vmem:[#allocation5 + $0x208] sm:$0xff] }
 0x556   : > { %v1895_v31 = vadd.f32 1e-05, %v1893_v29  ;;  %v2438_v29 = vld [vmem:[#allocation5 + $0x210] sm:$0xff] }
 0x557   : > { %v1894_v32 = vadd.f32 1e-05, %v1892_v30  ;;  %v4620_v30 = vpack.c.bf16 %v2437_v28, %v2436_v27  ;;  %v2787_v27 = vld [vmem:[#allocation5 + $0x270] sm:$0xff]  ;;  %v2788_v28 = vld [vmem:[#allocation5 + $0x278] sm:$0xff] }
 0x558   : > { %4789 = vrsqrt.f32 %v1895_v31  ;;  %v2439_v31 = vld [vmem:[#allocation5 + $0x218] sm:$0xff] }
 0x559   : > { %4791 = vrsqrt.f32 %v1894_v32  ;;  %v4624_v32 = vpack.c.bf16 %v2439_v31, %v2438_v29  ;;  %4621 = vmatprep.subr.bf16.mxu0 %v4620_v30  ;;  %v4656_v29 = vpack.c.bf16 %v2788_v28, %v2787_v27  ;;  %v3110_v28 = vld [vmem:[#allocation5 + $0x2d0] sm:$0xff] }
 0x55a   : > { %4623 = vmatpush3.bf16.msra.mxu0 %v4620_v30 }
 0x55b   : > { %4625 = vmatprep.subr.bf16.mxu0 %v4624_v32 }
 0x55e   : > { %4627 = vmatpush3.bf16.msra.mxu0 %v4624_v32 }
 0x562   : > { %v4790_v34 = vpop.eup %4789 }
 0x563   : > { %v4792_v35 = vpop.eup %4791  ;;  %v1903_v36 = vmul.f32 %v4790_v34, %v3734_v33  ;;  %v2430_v34 = vld [vmem:[#allocation5 + $0x1e8] sm:$0xff] }
 0x564   : > { %v1902_v38 = vmul.f32 %v4792_v35, %v3734_v33  ;;  %v2429_v33 = vld [vmem:[#allocation5 + $0x1e0] sm:$0xff] }
 0x565   : > { %v1907_v39 = vmul.f32 %v1903_v36, %v1879_v20  ;;  %v1905_v41 = vmul.f32 %v1903_v36, %v1871_v1  ;;  %v4604_v1 = vpack.c.bf16 %v2193_v62, %v2192_v61  ;;  %v4628_v35 = vpack.c.bf16 %v2430_v34, %v2429_v33  ;;  %v3759_v33 = vld [vmem:[%s5310_s3 + $0x4] ss:$0 sm:$0xff] }
 0x566   : > { %v1906_v40 = vmul.f32 %v1902_v38, %v1878_v22  ;;  %v1904_v43 = vmul.f32 %v1902_v38, %v1870_v3  ;;  %v2195_v3 = vld [vmem:[#allocation5 + $0x1b8] sm:$0xff] }
 0x567   : > { %v1913_v42 = vsub.f32 %v3735_v37, %v1907_v39  ;;  %v4608_v4 = vpack.c.bf16 %v2195_v3, %v2194_v2  ;;  %4629 = vmatprep.subr.bf16.mxu0 %v4628_v35  ;;  %v2431_v2 = vld [vmem:[#allocation5 + $0x1f0] sm:$0xff]  ;;  %v2432_v3 = vld [vmem:[#allocation5 + $0x1f8] sm:$0xff] }
 0x568   : > { %v1912_v44 = vsub.f32 %v3735_v37, %v1906_v40  ;;  %v4632_v6 = vpack.c.bf16 %v2432_v3, %v2431_v2  ;;  %v3760_v3 = vld [vmem:[%s5311_s4 + $0x4] ss:$0 sm:$0xff] }
 0x569   : > { %v1915_v45 = vadd.f32 %v1913_v42, %v1905_v41 }
 0x56a   : > { %v1914_v46 = vadd.f32 %v1912_v44, %v1904_v43 }
 0x56b   : > { %v1917_v47 = vmax.f32 %v1915_v45, 0.0 }
 0x56c   : > { %v1916_v48 = vmax.f32 %v1914_v46, 0.0 }
 0x56d   : > { %1919 = vst.msk [vmem:[#allocation3 + $0x10] sm:$0xff] %vm865_vm2, %v1917_v47 }
 0x56e   : > { %1918 = vst.msk [vmem:[#allocation3 + $0x8] sm:$0xff] %vm865_vm2, %v1916_v48 }
 0x574   : > { %v2100_v5 = vld [vmem:[#allocation3 + $0x10] sm:$0xff] }
 0x575   : > { %v1930_v50 = vld [vmem:[#allocation3 + $0x7] sm:$0xff]  ;;  %v1931_v51 = vld [vmem:[#allocation3 + $0xf] sm:$0xff] }
 0x576   : > { %4232 = vmatprep.mubr.msk.f32.mxu1 %vm865_vm2, %v1930_v50  ;;  %v1923_v55 = vld [vmem:[#allocation3 + $0x6] sm:$0xff]  ;;  %v1924_v60 = vld [vmem:[#allocation3 + $0xe] sm:$0xff] }
 0x577   : > { %4233 = vmatmul.mubr.msk.f32.vlgmr.msra.gmra.mrb[4].mxu1 %vm865_vm2, %v1931_v51  ;;  %v2099_v63 = vld [vmem:[#allocation3 + $0x8] sm:$0xff]  ;;  %v2190_v13 = vld [vmem:[#allocation3 + $0x11] sm:$0xff] }
 0x578   : > { %4591 = vmatpush3.bf16.msra.mxu1 %v4588_v18  ;;  %4243 = vmatprep.mubr.msk.f32.mxu1 %vm865_vm2, %v1923_v55  ;;  %v2189_v8 = vld [vmem:[#allocation3 + $0x9] sm:$0xff]  ;;  %v2280_v15 = vld [vmem:[#allocation3 + $0x12] sm:$0xff] }
 0x579   : > { %4593 = vmatprep.subr.bf16.mxu1 %v4592_v52  ;;  %v2279_v14 = vld [vmem:[#allocation3 + $0xa] sm:$0xff] }
 0x57c   : > { %4595 = vmatpush3.bf16.msra.mxu1 %v4592_v52 }
 0x57d   : > { %4597 = vmatprep.subr.bf16.mxu1 %v4596_v56 }
 0x57f   : > { %4244 = vmatmul.mubr.msk.f32.vlgmr.msra.gmra.mrb[4].mxu1 %vm865_vm2, %v1924_v60 }
 0x580   : > { %4599 = vmatpush3.bf16.msra.mxu1 %v4596_v56  ;;  %4254 = vmatprep.mubr.msk.f32.mxu1 %vm865_vm2, %v2099_v63 }
 0x581   : > { %4601 = vmatprep.subr.bf16.mxu1 %v4600_v59 }
 0x584   : > { %4603 = vmatpush3.bf16.msra.mxu1 %v4600_v59 }
 0x585   : > { %4605 = vmatprep.subr.bf16.mxu1 %v4604_v1 }
 0x587   : > { %4255 = vmatmul.mubr.msk.f32.vlgmr.msra.gmra.mrb[4].mxu1 %vm865_vm2, %v2100_v5 }
 0x588   : > { %4607 = vmatpush3.bf16.msra.mxu1 %v4604_v1  ;;  %4265 = vmatprep.mubr.msk.f32.mxu1 %vm865_vm2, %v2189_v8  ;;  %v2606_v8 = vld [vmem:[#allocation5 + $0x228] sm:$0xff] }
 0x589   : > { %4609 = vmatprep.subr.bf16.mxu1 %v4608_v4  ;;  %v4636_v10 = vpack.c.bf16 %v2606_v8, %v2605_v7  ;;  %v3761_v7 = vld [vmem:[%s5312_s5 + $0x4] ss:$0 sm:$0xff] }
 0x58c   : > { %4611 = vmatpush3.bf16.msra.mxu1 %v4608_v4 }
 0x58d   : > { %4613 = vmatprep.subr.bf16.mxu1 %v4612_v9 }
 0x58f   : > { %4266 = vmatmul.mubr.msk.f32.vlgmr.msra.gmra.mrb[4].mxu1 %vm865_vm2, %v2190_v13 }
 0x590   : > { %4615 = vmatpush3.bf16.msra.mxu1 %v4612_v9  ;;  %4276 = vmatprep.mubr.msk.f32.mxu1 %vm865_vm2, %v2279_v14 }
 0x591   : > { %4617 = vmatprep.subr.bf16.mxu1 %v4616_v12 }
 0x594   : > { %4619 = vmatpush3.bf16.msra.mxu1 %v4616_v12  ;;  %v2608_v12 = vld [vmem:[#allocation5 + $0x238] sm:$0xff] }
 0x595   : > { %v4640_v13 = vpack.c.bf16 %v2608_v12, %v2607_v11 }
 0x597   : > { %4277 = vmatmul.mubr.msk.f32.vlgmr.msra.gmra.mrb[4].mxu1 %vm865_vm2, %v2280_v15  ;;  %v2695_v15 = vld [vmem:[#allocation5 + $0x240] sm:$0xff] }
 0x66a   : > { %v4278_v17 = vpop.f32.mrb[4].mxu1 }
 0x66b   : > { %v2374_v18 = vadd.f32 %v4278_v17, %v3746_v16  ;;  %v2358_v19 = vpop.f32.mrb[5].mxu1 }
 0x66c   : > { %v2373_v20 = vadd.f32 %v3746_v16, %v2358_v19  ;;  %v2696_v16 = vld [vmem:[#allocation5 + $0x248] sm:$0xff]  ;;  %v2697_v19 = vld [vmem:[#allocation5 + $0x250] sm:$0xff] }
 0x66d   : > { %v2378_v21 = vsel %vm865_vm2, %v2374_v18, 0.0  ;;  %v2384_v22 = vmul.f32 %v2374_v18, %v2374_v18 }
 0x66e   : > { %2379 = vadd.xlane.f32.xlu1 %v2378_v21  ;;  %v2375_v23 = vsel %vm865_vm2, %v2373_v20, 0.0  ;;  %v2383_v24 = vmul.f32 %v2373_v20, %v2373_v20 }
 0x66f   : > { %2376 = vadd.xlane.f32.xlu0 %v2375_v23  ;;  %v2388_v25 = vsel %vm865_vm2, %v2384_v22, 0.0  ;;  %v2785_v23 = vld [vmem:[#allocation5 + $0x260] sm:$0xff] }
 0x670   : > { %v2385_v26 = vsel %vm865_vm2, %v2383_v24, 0.0  ;;  %v2786_v24 = vld [vmem:[#allocation5 + $0x268] sm:$0xff] }
 0x672   : > { %2389 = vadd.xlane.f32.xlu1 %v2388_v25 }
 0x673   : > { %2386 = vadd.xlane.f32.xlu0 %v2385_v26  ;;  %v4652_v26 = vpack.c.bf16 %v2786_v24, %v2785_v23  ;;  %v3108_v24 = vld [vmem:[#allocation5 + $0x2c0] sm:$0xff] }
 0x6fb   : > { %v2380_v36 = vpop.xlane.xlu1 %2379 }
 0x6fc   : > { %v2382_v37 = vmul.f32 0.03125, %v2380_v36  ;;  %v2377_v38 = vpop.xlane.xlu0 %2376 }
 0x6fd   : > { %v2381_v39 = vmul.f32 0.03125, %v2377_v38 }
 0x6fe   : > { %v2394_v41 = vmul.f32 %v2382_v37, %v2382_v37 }
 0x6ff   : > { %v2390_v40 = vpop.xlane.xlu1 %2389  ;;  %v2393_v44 = vmul.f32 %v2381_v39, %v2381_v39 }
 0x700   : > { %v2392_v42 = vmul.f32 0.03125, %v2390_v40  ;;  %v2387_v43 = vpop.xlane.xlu0 %2386 }
 0x701   : > { %v2391_v45 = vmul.f32 0.03125, %v2387_v43 }
 0x702   : > { %v2396_v46 = vsub.f32 %v2392_v42, %v2394_v41 }
 0x703   : > { %v2395_v47 = vsub.f32 %v2391_v45, %v2393_v44  ;;  %v2939_v44 = vld [vmem:[#allocation5 + $0x2a0] sm:$0xff]  ;;  %v2940_v45 = vld [vmem:[#allocation5 + $0x2a8] sm:$0xff] }
 0x704   : > { %v2398_v48 = vadd.f32 1e-05, %v2396_v46  ;;  %v2941_v46 = vld [vmem:[#allocation5 + $0x2b0] sm:$0xff] }
 0x705   : > { %v2397_v0 = vadd.f32 1e-05, %v2395_v47  ;;  %v4660_v47 = vpack.c.bf16 %v2940_v45, %v2939_v44  ;;  %v3290_v44 = vld [vmem:[#allocation5 + $0x310] sm:$0xff]  ;;  %v3291_v45 = vld [vmem:[#allocation5 + $0x318] sm:$0xff] }
 0x706   : > { %4793 = vrsqrt.f32 %v2398_v48  ;;  %v2942_v48 = vld [vmem:[#allocation5 + $0x2b8] sm:$0xff] }
 0x707   : > { %4795 = vrsqrt.f32 %v2397_v0  ;;  %v4664_v0 = vpack.c.bf16 %v2942_v48, %v2941_v46  ;;  %4661 = vmatprep.subr.bf16.mxu1 %v4660_v47  ;;  %v4696_v46 = vpack.c.bf16 %v3291_v45, %v3290_v44 }
 0x708   : > { %4663 = vmatpush3.bf16.msra.mxu1 %v4660_v47 }
 0x709   : > { %4665 = vmatprep.subr.bf16.mxu1 %v4664_v0 }
 0x70c   : > { %4667 = vmatpush3.bf16.msra.mxu1 %v4664_v0 }
 0x710   : > { %v4794_v50 = vpop.eup %4793 }
 0x711   : > { %v4796_v51 = vpop.eup %4795  ;;  %v2406_v52 = vmul.f32 %v4794_v50, %v3747_v49  ;;  %v2933_v50 = vld [vmem:[#allocation5 + $0x288] sm:$0xff] }
 0x712   : > { %v2405_v54 = vmul.f32 %v4796_v51, %v3747_v49  ;;  %v2932_v49 = vld [vmem:[#allocation5 + $0x280] sm:$0xff] }
 0x713   : > { %v2410_v55 = vmul.f32 %v2406_v52, %v2382_v37  ;;  %v2408_v57 = vmul.f32 %v2406_v52, %v2374_v18  ;;  %v4644_v18 = vpack.c.bf16 %v2696_v16, %v2695_v15  ;;  %v4668_v51 = vpack.c.bf16 %v2933_v50, %v2932_v49  ;;  %v3772_v49 = vld [vmem:[%s5310_s3 + $0x5] ss:$0 sm:$0xff] }
 0x714   : > { %v2409_v56 = vmul.f32 %v2405_v54, %v2381_v39  ;;  %v2407_v59 = vmul.f32 %v2405_v54, %v2373_v20  ;;  %v2698_v20 = vld [vmem:[#allocation5 + $0x258] sm:$0xff] }
 0x715   : > { %v2416_v58 = vsub.f32 %v3748_v53, %v2410_v55  ;;  %v4648_v21 = vpack.c.bf16 %v2698_v20, %v2697_v19  ;;  %4669 = vmatprep.subr.bf16.mxu1 %v4668_v51  ;;  %v2934_v19 = vld [vmem:[#allocation5 + $0x290] sm:$0xff]  ;;  %v2935_v20 = vld [vmem:[#allocation5 + $0x298] sm:$0xff] }
 0x716   : > { %v2415_v60 = vsub.f32 %v3748_v53, %v2409_v56  ;;  %v4672_v23 = vpack.c.bf16 %v2935_v20, %v2934_v19  ;;  %v3773_v19 = vld [vmem:[%s5311_s4 + $0x5] ss:$0 sm:$0xff] }
 0x717   : > { %v2418_v61 = vadd.f32 %v2416_v58, %v2408_v57 }
 0x718   : > { %v2417_v62 = vadd.f32 %v2415_v60, %v2407_v59 }
 0x719   : > { %v2420_v63 = vmax.f32 %v2418_v61, 0.0 }
 0x71a   : > { %v2419_v1 = vmax.f32 %v2417_v62, 0.0 }
 0x71b   : > { %2422 = vst.msk [vmem:[#allocation4 + $0x10] sm:$0xff] %vm865_vm2, %v2420_v63 }
 0x71c   : > { %2421 = vst.msk [vmem:[#allocation4 + $0x8] sm:$0xff] %vm865_vm2, %v2419_v1 }
 0x722   : > { %v2603_v22 = vld [vmem:[#allocation4 + $0x10] sm:$0xff] }
 0x723   : > { %v2433_v4 = vld [vmem:[#allocation4 + $0x7] sm:$0xff]  ;;  %v2434_v5 = vld [vmem:[#allocation4 + $0xf] sm:$0xff] }
 0x724   : > { %4287 = vmatprep.mubr.msk.f32.mxu0 %vm865_vm2, %v2433_v4  ;;  %v2426_v9 = vld [vmem:[#allocation4 + $0x6] sm:$0xff]  ;;  %v2427_v14 = vld [vmem:[#allocation4 + $0xe] sm:$0xff] }
 0x725   : > { %4288 = vmatmul.mubr.msk.f32.vlgmr.msra.gmra.mrb[4].mxu0 %vm865_vm2, %v2434_v5  ;;  %v2602_v17 = vld [vmem:[#allocation4 + $0x8] sm:$0xff]  ;;  %v2693_v30 = vld [vmem:[#allocation4 + $0x11] sm:$0xff] }
 0x726   : > { %4631 = vmatpush3.bf16.msra.mxu0 %v4628_v35  ;;  %4298 = vmatprep.mubr.msk.f32.mxu0 %vm865_vm2, %v2426_v9  ;;  %v2692_v25 = vld [vmem:[#allocation4 + $0x9] sm:$0xff]  ;;  %v2783_v32 = vld [vmem:[#allocation4 + $0x12] sm:$0xff] }
 0x727   : > { %4633 = vmatprep.subr.bf16.mxu0 %v4632_v6  ;;  %v2782_v31 = vld [vmem:[#allocation4 + $0xa] sm:$0xff] }
 0x72a   : > { %4635 = vmatpush3.bf16.msra.mxu0 %v4632_v6 }
 0x72b   : > { %4637 = vmatprep.subr.bf16.mxu0 %v4636_v10 }
 0x72d   : > { %4299 = vmatmul.mubr.msk.f32.vlgmr.msra.gmra.mrb[4].mxu0 %vm865_vm2, %v2427_v14 }
 0x72e   : > { %4639 = vmatpush3.bf16.msra.mxu0 %v4636_v10  ;;  %4309 = vmatprep.mubr.msk.f32.mxu0 %vm865_vm2, %v2602_v17 }
 0x72f   : > { %4641 = vmatprep.subr.bf16.mxu0 %v4640_v13 }
 0x732   : > { %4643 = vmatpush3.bf16.msra.mxu0 %v4640_v13 }
 0x733   : > { %4645 = vmatprep.subr.bf16.mxu0 %v4644_v18 }
 0x735   : > { %4310 = vmatmul.mubr.msk.f32.vlgmr.msra.gmra.mrb[4].mxu0 %vm865_vm2, %v2603_v22 }
 0x736   : > { %4647 = vmatpush3.bf16.msra.mxu0 %v4644_v18  ;;  %4320 = vmatprep.mubr.msk.f32.mxu0 %vm865_vm2, %v2692_v25  ;;  %v3109_v25 = vld [vmem:[#allocation5 + $0x2c8] sm:$0xff] }
 0x737   : > { %4649 = vmatprep.subr.bf16.mxu0 %v4648_v21  ;;  %v4676_v27 = vpack.c.bf16 %v3109_v25, %v3108_v24 }
 0x73a   : > { %4651 = vmatpush3.bf16.msra.mxu0 %v4648_v21 }
 0x73b   : > { %4653 = vmatprep.subr.bf16.mxu0 %v4652_v26 }
 0x73d   : > { %4321 = vmatmul.mubr.msk.f32.vlgmr.msra.gmra.mrb[4].mxu0 %vm865_vm2, %v2693_v30 }
 0x73e   : > { %4655 = vmatpush3.bf16.msra.mxu0 %v4652_v26  ;;  %4331 = vmatprep.mubr.msk.f32.mxu0 %vm865_vm2, %v2782_v31 }
 0x73f   : > { %4657 = vmatprep.subr.bf16.mxu0 %v4656_v29 }
 0x742   : > { %4659 = vmatpush3.bf16.msra.mxu0 %v4656_v29  ;;  %v3111_v29 = vld [vmem:[#allocation5 + $0x2d8] sm:$0xff] }
 0x743   : > { %v4680_v30 = vpack.c.bf16 %v3111_v29, %v3110_v28 }
 0x745   : > { %4332 = vmatmul.mubr.msk.f32.vlgmr.msra.gmra.mrb[4].mxu0 %vm865_vm2, %v2783_v32  ;;  %v3198_v32 = vld [vmem:[#allocation5 + $0x2e0] sm:$0xff] }
 0x818   : > { %v4333_v34 = vpop.f32.mrb[4].mxu0 }
 0x819   : > { %v2877_v35 = vadd.f32 %v4333_v34, %v3759_v33  ;;  %v2861_v36 = vpop.f32.mrb[5].mxu0 }
 0x81a   : > { %v2876_v37 = vadd.f32 %v3759_v33, %v2861_v36  ;;  %v3199_v33 = vld [vmem:[#allocation5 + $0x2e8] sm:$0xff]  ;;  %v3200_v36 = vld [vmem:[#allocation5 + $0x2f0] sm:$0xff] }
 0x81b   : > { %v2881_v38 = vsel %vm865_vm2, %v2877_v35, 0.0  ;;  %v2887_v39 = vmul.f32 %v2877_v35, %v2877_v35 }
 0x81c   : > { %2882 = vadd.xlane.f32.xlu1 %v2881_v38  ;;  %v2878_v40 = vsel %vm865_vm2, %v2876_v37, 0.0  ;;  %v2886_v41 = vmul.f32 %v2876_v37, %v2876_v37 }
 0x81d   : > { %2879 = vadd.xlane.f32.xlu0 %v2878_v40  ;;  %v2891_v42 = vsel %vm865_vm2, %v2887_v39, 0.0  ;;  %v3288_v40 = vld [vmem:[#allocation5 + $0x300] sm:$0xff] }
 0x81e   : > { %v2888_v43 = vsel %vm865_vm2, %v2886_v41, 0.0  ;;  %v3289_v41 = vld [vmem:[#allocation5 + $0x308] sm:$0xff] }
 0x820   : > { %2892 = vadd.xlane.f32.xlu1 %v2891_v42 }
 0x821   : > { %2889 = vadd.xlane.f32.xlu0 %v2888_v43  ;;  %v4692_v43 = vpack.c.bf16 %v3289_v41, %v3288_v40 }
 0x8a9   : > { %v2883_v52 = vpop.xlane.xlu1 %2882 }
 0x8aa   : > { %v2885_v53 = vmul.f32 0.03125, %v2883_v52  ;;  %v2880_v54 = vpop.xlane.xlu0 %2879 }
 0x8ab   : > { %v2884_v55 = vmul.f32 0.03125, %v2880_v54 }
 0x8ac   : > { %v2897_v57 = vmul.f32 %v2885_v53, %v2885_v53 }
 0x8ad   : > { %v2893_v56 = vpop.xlane.xlu1 %2892  ;;  %v2896_v60 = vmul.f32 %v2884_v55, %v2884_v55 }
 0x8ae   : > { %v2895_v58 = vmul.f32 0.03125, %v2893_v56  ;;  %v2890_v59 = vpop.xlane.xlu0 %2889 }
 0x8af   : > { %v2894_v61 = vmul.f32 0.03125, %v2890_v59 }
 0x8b0   : > { %v2899_v62 = vsub.f32 %v2895_v58, %v2897_v57 }
 0x8b1   : > { %v2898_v63 = vsub.f32 %v2894_v61, %v2896_v60  ;;  %v3431_v60 = vld [vmem:[%s5313_s6] sm:$0xff]  ;;  %v3432_v61 = vld [vmem:[%s5313_s6 + $0x8] sm:$0xff] }
 0x8b2   : > { %v2901_v1 = vadd.f32 1e-05, %v2899_v62  ;;  %v3433_v62 = vld [vmem:[%s5313_s6 + $0x10] sm:$0xff] }
 0x8b3   : > { %v2900_v2 = vadd.f32 1e-05, %v2898_v63  ;;  %v4700_v63 = vpack.c.bf16 %v3432_v61, %v3431_v60 }
 0x8b4   : > { %4797 = vrsqrt.f32 %v2901_v1  ;;  %v3434_v1 = vld [vmem:[%s5313_s6 + $0x18] sm:$0xff] }
 0x8b5   : > { %4799 = vrsqrt.f32 %v2900_v2  ;;  %v4704_v2 = vpack.c.bf16 %v3434_v1, %v3433_v62  ;;  %4701 = vmatprep.subr.bf16.mxu0 %v4700_v63 }
 0x8b6   : > { %4703 = vmatpush3.bf16.msra.mxu0 %v4700_v63 }
 0x8b7   : > { %4705 = vmatprep.subr.bf16.mxu0 %v4704_v2 }
 0x8ba   : > { %4707 = vmatpush3.bf16.msra.mxu0 %v4704_v2 }
 0x8be   : > { %v4798_v4 = vpop.eup %4797 }
 0x8bf   : > { %v4800_v5 = vpop.eup %4799  ;;  %v2909_v6 = vmul.f32 %v4798_v4, %v3760_v3  ;;  %v3529_v4 = vld [vmem:[%s362_s20] sm:$0xff] }
 0x8c0   : > { %v2908_v8 = vmul.f32 %v4800_v5, %v3760_v3  ;;  %v3530_v3 = vld [vmem:[%s362_s20 + $0x8] sm:$0xff] }
 0x8c1   : > { %v2913_v9 = vmul.f32 %v2909_v6, %v2885_v53  ;;  %v2911_v11 = vmul.f32 %v2909_v6, %v2877_v35  ;;  %v4684_v35 = vpack.c.bf16 %v3199_v33, %v3198_v32 }
 0x8c2   : > { %v2912_v10 = vmul.f32 %v2908_v8, %v2884_v55  ;;  %v2910_v13 = vmul.f32 %v2908_v8, %v2876_v37  ;;  %v3201_v37 = vld [vmem:[#allocation5 + $0x2f8] sm:$0xff] }
 0x8c3   : > { %v2919_v12 = vsub.f32 %v3761_v7, %v2913_v9  ;;  %v4688_v38 = vpack.c.bf16 %v3201_v37, %v3200_v36  ;;  %v3775_v37 = vld [vmem:[%s5314_s7] ss:$0 sm:$0xff] }
 0x8c4   : > { %v2918_v14 = vsub.f32 %v3761_v7, %v2912_v10 }
 0x8c5   : > { %v2921_v15 = vadd.f32 %v2919_v12, %v2911_v11 }
 0x8c6   : > { %v2920_v16 = vadd.f32 %v2918_v14, %v2910_v13 }
 0x8c7   : > { %v2923_v17 = vmax.f32 %v2921_v15, 0.0 }
 0x8c8   : > { %v2922_v18 = vmax.f32 %v2920_v16, 0.0 }
 0x8c9   : > { %2925 = vst.msk [vmem:[#allocation3 + $0x10] sm:$0xff] %vm865_vm2, %v2923_v17 }
 0x8ca   : > { %2924 = vst.msk [vmem:[#allocation3 + $0x8] sm:$0xff] %vm865_vm2, %v2922_v18 }
 0x8d0   : > { %v3106_v39 = vld [vmem:[#allocation3 + $0x10] sm:$0xff] }
 0x8d1   : > { %v2936_v21 = vld [vmem:[#allocation3 + $0x7] sm:$0xff]  ;;  %v2937_v22 = vld [vmem:[#allocation3 + $0xf] sm:$0xff] }
 0x8d2   : > { %4342 = vmatprep.mubr.msk.f32.mxu1 %vm865_vm2, %v2936_v21  ;;  %v2929_v26 = vld [vmem:[#allocation3 + $0x6] sm:$0xff]  ;;  %v2930_v31 = vld [vmem:[#allocation3 + $0xe] sm:$0xff] }
 0x8d3   : > { %4343 = vmatmul.mubr.msk.f32.vlgmr.msra.gmra.mrb[6].mxu1 %vm865_vm2, %v2937_v22  ;;  %v3105_v34 = vld [vmem:[#allocation3 + $0x8] sm:$0xff]  ;;  %v3196_v47 = vld [vmem:[#allocation3 + $0x11] sm:$0xff] }
 0x8d4   : > { %4671 = vmatpush3.bf16.msra.mxu1 %v4668_v51  ;;  %4353 = vmatprep.mubr.msk.f32.mxu1 %vm865_vm2, %v2929_v26  ;;  %v3195_v42 = vld [vmem:[#allocation3 + $0x9] sm:$0xff]  ;;  %v3286_v0 = vld [vmem:[#allocation3 + $0x12] sm:$0xff] }
 0x8d5   : > { %4673 = vmatprep.subr.bf16.mxu1 %v4672_v23  ;;  %v3285_v48 = vld [vmem:[#allocation3 + $0xa] sm:$0xff] }
 0x8d8   : > { %4675 = vmatpush3.bf16.msra.mxu1 %v4672_v23  ;;  %v3774_v23 = vld [vmem:[%s5312_s5 + $0x5] ss:$0 sm:$0xff] }
 0x8d9   : > { %4677 = vmatprep.subr.bf16.mxu1 %v4676_v27 }
 0x8db   : > { %4354 = vmatmul.mubr.msk.f32.vlgmr.msra.gmra.mrb[6].mxu1 %vm865_vm2, %v2930_v31 }
 0x8dc   : > { %4679 = vmatpush3.bf16.msra.mxu1 %v4676_v27  ;;  %4364 = vmatprep.mubr.msk.f32.mxu1 %vm865_vm2, %v3105_v34 }
 0x8dd   : > { %4681 = vmatprep.subr.bf16.mxu1 %v4680_v30 }
 0x8e0   : > { %4683 = vmatpush3.bf16.msra.mxu1 %v4680_v30 }
 0x8e1   : > { %4685 = vmatprep.subr.bf16.mxu1 %v4684_v35 }
 0x8e3   : > { %4365 = vmatmul.mubr.msk.f32.vlgmr.msra.gmra.mrb[6].mxu1 %vm865_vm2, %v3106_v39 }
 0x8e4   : > { %4687 = vmatpush3.bf16.msra.mxu1 %v4684_v35  ;;  %4375 = vmatprep.mubr.msk.f32.mxu1 %vm865_vm2, %v3195_v42 }
 0x8e5   : > { %4689 = vmatprep.subr.bf16.mxu1 %v4688_v38 }
 0x8e8   : > { %4691 = vmatpush3.bf16.msra.mxu1 %v4688_v38 }
 0x8e9   : > { %4693 = vmatprep.subr.bf16.mxu1 %v4692_v43 }
 0x8eb   : > { %4376 = vmatmul.mubr.msk.f32.vlgmr.msra.gmra.mrb[6].mxu1 %vm865_vm2, %v3196_v47 }
 0x8ec   : > { %4695 = vmatpush3.bf16.msra.mxu1 %v4692_v43  ;;  %4386 = vmatprep.mubr.msk.f32.mxu1 %vm865_vm2, %v3285_v48 }
 0x8ed   : > { %4697 = vmatprep.subr.bf16.mxu1 %v4696_v46 }
 0x8f0   : > { %4699 = vmatpush3.bf16.msra.mxu1 %v4696_v46 }
 0x8f3   : > { %4387 = vmatmul.mubr.msk.f32.vlgmr.msra.gmra.mrb[6].mxu1 %vm865_vm2, %v3286_v0 }
 0x9c6   : > { %v4388_v50 = vpop.f32.mrb[6].mxu1 }
 0x9c7   : > { %v3380_v51 = vadd.f32 %v4388_v50, %v3772_v49  ;;  %v3364_v52 = vpop.f32.mrb[7].mxu1 }
 0x9c8   : > { %v3379_v53 = vadd.f32 %v3772_v49, %v3364_v52 }
 0x9c9   : > { %v3384_v54 = vsel %vm865_vm2, %v3380_v51, 0.0  ;;  %v3390_v55 = vmul.f32 %v3380_v51, %v3380_v51 }
 0x9ca   : > { %3385 = vadd.xlane.f32.xlu1 %v3384_v54  ;;  %v3381_v56 = vsel %vm865_vm2, %v3379_v53, 0.0  ;;  %v3389_v57 = vmul.f32 %v3379_v53, %v3379_v53 }
 0x9cb   : > { %3382 = vadd.xlane.f32.xlu0 %v3381_v56  ;;  %v3394_v58 = vsel %vm865_vm2, %v3390_v55, 0.0 }
 0x9cc   : > { %v3391_v59 = vsel %vm865_vm2, %v3389_v57, 0.0 }
 0x9ce   : > { %3395 = vadd.xlane.f32.xlu1 %v3394_v58 }
 0x9cf   : > { %3392 = vadd.xlane.f32.xlu0 %v3391_v59 }
 0x9df   : > { %3535 = vrot.lane.b32.xlu1 %v3530_v3, %s4853_s21 }
 0x9e5   : > { %3533 = vrot.lane.b32.xlu0 %v3529_v4, %s4853_s21 }
 0xa57   : > { %v3386_v5 = vpop.xlane.xlu1 %3385 }
 0xa58   : > { %v3388_v6 = vmul.f32 0.03125, %v3386_v5  ;;  %v3383_v7 = vpop.xlane.xlu0 %3382 }
 0xa59   : > { %v3387_v8 = vmul.f32 0.03125, %v3383_v7 }
 0xa5a   : > { %v3400_v10 = vmul.f32 %v3388_v6, %v3388_v6 }
 0xa5b   : > { %v3396_v9 = vpop.xlane.xlu1 %3395  ;;  %v3399_v13 = vmul.f32 %v3387_v8, %v3387_v8 }
 0xa5c   : > { %v3398_v11 = vmul.f32 0.03125, %v3396_v9  ;;  %v3393_v12 = vpop.xlane.xlu0 %3392 }
 0xa5d   : > { %v3397_v14 = vmul.f32 0.03125, %v3393_v12 }
 0xa5e   : > { %v3402_v15 = vsub.f32 %v3398_v11, %v3400_v10 }
 0xa5f   : > { %v3401_v16 = vsub.f32 %v3397_v14, %v3399_v13  ;;  %v3536_v49 = vpop.permute.xlu1 %3535 }
 0xa60   : > { %v3404_v17 = vadd.f32 1e-05, %v3402_v15  ;;  %v3534_v46 = vpop.permute.xlu0 %3533 }
 0xa61   : > { %v3403_v18 = vadd.f32 1e-05, %v3401_v16 }
 0xa62   : > { %4801 = vrsqrt.f32 %v3404_v17 }
 0xa63   : > { %4803 = vrsqrt.f32 %v3403_v18 }
 0xa6c   : > { %v4802_v20 = vpop.eup %4801 }
 0xa6d   : > { %v4804_v21 = vpop.eup %4803  ;;  %v3412_v22 = vmul.f32 %v4802_v20, %v3773_v19 }
 0xa6e   : > { %v3411_v24 = vmul.f32 %v4804_v21, %v3773_v19 }
 0xa6f   : > { %v3416_v25 = vmul.f32 %v3412_v22, %v3388_v6  ;;  %v3414_v27 = vmul.f32 %v3412_v22, %v3380_v51 }
 0xa70   : > { %v3415_v26 = vmul.f32 %v3411_v24, %v3387_v8  ;;  %v3413_v29 = vmul.f32 %v3411_v24, %v3379_v53 }
 0xa71   : > { %v3422_v28 = vsub.f32 %v3774_v23, %v3416_v25 }
 0xa72   : > { %v3421_v30 = vsub.f32 %v3774_v23, %v3415_v26 }
 0xa73   : > { %v3424_v31 = vadd.f32 %v3422_v28, %v3414_v27 }
 0xa74   : > { %v3423_v32 = vadd.f32 %v3421_v30, %v3413_v29 }
 0xa75   : > { %v3426_v33 = vmax.f32 %v3424_v31, 0.0 }
 0xa76   : > { %v3425_v34 = vmax.f32 %v3423_v32, 0.0 }
 0xa77   : > { %3428 = vst.msk [vmem:[#allocation4 + $0x10] sm:$0xff] %vm865_vm2, %v3426_v33 }
 0xa78   : > { %3427 = vst.msk [vmem:[#allocation4 + $0x8] sm:$0xff] %vm865_vm2, %v3425_v34 }
 0xa7e   : > { %v3430_v36 = vld [vmem:[#allocation4 + $0x10] sm:$0xff] }
 0xa7f   : > { %v3429_v35 = vld [vmem:[#allocation4 + $0x8] sm:$0xff] }
 0xa80   : > { %4397 = vmatprep.mubr.msk.f32.mxu0 %vm865_vm2, %v3429_v35 }
 0xa81   : > { %4398 = vmatmul.mubr.msk.f32.vlgmr.msra.gmra.mrb[6].mxu0 %vm865_vm2, %v3430_v36 }
 0xb54   : > { %v4399_v38 = vpop.f32.mrb[6].mxu0 }
 0xb55   : > { %v3520_v39 = vadd.f32 %v4399_v38, %v3775_v37  ;;  %v3514_v40 = vpop.f32.mrb[7].mxu0 }
 0xb56   : > { %v3515_v41 = vadd.f32 %v3775_v37, %v3514_v40 }
 0xb57   : > { %v3524_v42 = vmul.f32 0.5, %v3520_v39  ;;  %3553 = vst.msk [vmem:[%s5298_s12 + $0x8] sm:$0xff] %vm3551_vm4, %v3520_v39 }
 0xb58   : > { %v3523_v43 = vmul.f32 0.5, %v3515_v41  ;;  %3552 = vst.msk [vmem:[%s5298_s12] sm:$0xff] %vm3551_vm4, %v3515_v41 }
 0xb59   : > { %v3527_v44 = vmul.f32 1.442695, %v3524_v42 }
 0xb5a   : > { %v3525_v45 = vmul.f32 1.442695, %v3523_v43 }
 0xb5c   : > { %4805 = vpow2.f32 %v3525_v45 }
 0xb5d   : > { %4807 = vpow2.f32 %v3527_v44 }
 0xb66   : > { %v4806_v47 = vpop.eup %4805 }
 0xb67   : > { %v3539_v48 = vmul.f32 %v4806_v47, %v3534_v46  ;;  %v4808_v0 = vpop.eup %4807 }
 0xb68   : > { %v3540_v50 = vmul.f32 %v4808_v0, %v3536_v49 }
 0xb69   : > { %3543 = vrot.lane.b32.xlu1 %v3539_v48, %s4854_s27 }
 0xb6d   : > { %3545 = vrot.lane.b32.xlu1 %v3540_v50, %s4854_s27 }
 0xbdb   : > { %v3544_v51 = vpop.permute.xlu1 %3543 }
 0xbdc   : > { %v3549_v52 = vadd.f32 %v3544_v51, %v3515_v41 }
 0xbde   : > { %3556 = vrot.lane.b32.xlu0 %v3549_v52, %s4855_s13 }
 0xbdf   : > { %v3546_v53 = vpop.permute.xlu1 %3545 }
 0xbe0   : > { %v3550_v54 = vadd.f32 %v3546_v53, %v3520_v39 }
 0xbe2   : > { %3558 = vrot.lane.b32.xlu1 %v3550_v54, %s4855_s13 }
 0xc50   : > { %v3557_v55 = vpop.permute.xlu0 %3556 }
 0xc51   : > { %3563 = vst.msk [vmem:[%s5298_s12] sm:$0xff] %vm3562_vm5, %v3557_v55 }
 0xc54   : > { %v3559_v56 = vpop.permute.xlu1 %3558 }
 0xc55   : > { %3564 = vst.msk [vmem:[%s5298_s12 + $0x8] sm:$0xff] %vm3562_vm5, %v3559_v56 }
 0xc56 PF: > { %s20_s30 = sadd.s32 1, %s4847_s30  }
 0xc57   : > { %p17_p3 = scmp.ge.s32.totalorder %s20_s30, 4  }
 0xc59   :  { %19 = sbr.rel (!%p17_p3) target bundleno = 1 (0x1), region = 122 }
 0xc60   :  { %3586 = vsyncpa [#allocation6], 1 }
 0xc61   :  { %3588 = vsyncpa [#allocation6 + $0x1], 1 }

</bundles_post_ra>
